<compile_context>
chip_gen: v6e
topology: v6e:2x2x1
jax: 0.10.0
libtpu: 0.0.40
codegen_flags: <defaults>
</compile_context>

<pallas_src>
import functools

import jax
import jax.numpy as jnp
import numpy as np
from jax.experimental import pallas as pl
from jax.experimental.pallas import tpu as pltpu

EPS_GMM = 1e-15
EPS_BN = 1e-5


# ----------------------------------------------------------------------------- helpers
def _full_spec(shape):
    nd = len(shape)
    return pl.BlockSpec(shape, lambda i, _nd=nd: (0,) * _nd)


# ----------------------------------------------------------------------------- fused kernel
def _fused_kernel(x_ref, ea_ref, src_ref, dst_ref, bat_ref,
                  enc_w_ref, g_ref, hh_ref, rows_ref, gauss_ref, rep_ref, sel_ref,
                  fin_ref, o_ref, *, num_layers, ends_in_sigmoid):
    f32 = jnp.float32
    N = x_ref.shape[0]
    E = ea_ref.shape[0]
    B = o_ref.shape[0]
    H = hh_ref.shape[-1]

    # row-slab layout (must match pack_params)
    r_encb = 0
    r_convb = 1
    r_bng = r_convb + num_layers
    r_bnb = r_bng + 4
    r_linb = r_bnb + 4

    # ---- graph structure: gather / scatter / pool one-hots built in-kernel (VPU) -------
    n_lane = jax.lax.broadcasted_iota(jnp.int32, (E, N), 1)
    src_oh = (src_ref[...] == n_lane).astype(f32)                          # [E, N]
    n_sub = jax.lax.broadcasted_iota(jnp.int32, (N, E), 0)
    dstT = (n_sub == dst_ref[...]).astype(f32)                             # [N, E]
    g_sub = jax.lax.broadcasted_iota(jnp.int32, (B, N), 0)
    pool = (g_sub == bat_ref[...]).astype(f32)                             # [B, N]
    deg_inv = 1.0 / jnp.maximum(jnp.sum(dstT, axis=1, keepdims=True), 1.0)  # [N, 1]

    # ---- all L*K gaussian edge weights at once: one matmul + one exp --------------------
    # ea_ref holds [ea^2 | ea | 1]; gauss_ref folds 0.5/(eps+sigma^2), mu and the constant,
    # so the exp argument equals -0.5 * sum_d (ea-mu)^2 / (eps+sigma^2) <= 0 (safe).
    w_all = jnp.exp(-jnp.dot(ea_ref[...], gauss_ref[...],
                             preferred_element_type=f32))                  # [E, L*K]

    sel_S = sel_ref[...]                                                   # [K*H, H]

    # ---- node encoder -------------------------------------------------------------------
    x = jnp.dot(x_ref[...], enc_w_ref[...], preferred_element_type=f32) + rows_ref[r_encb]

    # ---- GMMConv layers (mean aggregation + root weight + bias), K fused into wide matmuls
    for l in range(num_layers):
        if l > 0:
            x = jnp.tanh(x)                                    # tanh between conv layers
        h = jnp.dot(x, g_ref[l], preferred_element_type=f32)               # [N, K*H]
        hs = jnp.dot(src_oh, h, preferred_element_type=f32)                # [E, K*H]
        w_rep = jnp.dot(w_all, rep_ref[l], preferred_element_type=f32)     # [E, K*H]
        msg = jnp.dot(hs * w_rep, sel_S, preferred_element_type=f32)       # [E, H]
        agg = jnp.dot(dstT, msg, preferred_element_type=f32) * deg_inv     # [N, H]
        x = agg + jnp.dot(x, hh_ref[l], preferred_element_type=f32) + rows_ref[r_convb + l]

    # ---- global_add_pool ----------------------------------------------------------------
    p = jnp.dot(pool, x, preferred_element_type=f32)                       # [B, H]

    # ---- BN / Linear / tanh head (training-mode batch statistics) ------------------------
    def bn(v, i):
        mean = jnp.mean(v, axis=0, keepdims=True)
        var = jnp.mean((v - mean) ** 2, axis=0, keepdims=True)             # biased
        return (v - mean) * jax.lax.rsqrt(var + EPS_BN) * rows_ref[r_bng + i] + rows_ref[r_bnb + i]

    for i in range(3):
        p = bn(p, i)
        p = jnp.tanh(jnp.dot(p, hh_ref[num_layers + i], preferred_element_type=f32)
                     + rows_ref[r_linb + i])
    p = bn(p, 3)
    p = jnp.dot(p, fin_ref[0:H, :], preferred_element_type=f32) + fin_ref[H:H + 1, :]
    if ends_in_sigmoid:
        p = jax.nn.sigmoid(p)
    o_ref[...] = p


# ----------------------------------------------------------------------------- param packing (once, off the hot path)
def pack_params(params):
    convs = params['convs']
    H = params['enc_w'].shape[1]
    L = len(convs)
    K, D = convs[0][1].shape
    KH, LK = K * H, L * K

    # conv feature-transform weights kept in their native [H, K*H] layout
    g_all = jnp.stack([p[0] for p in convs])                               # [L, H, K*H]

    # square (H,H) weights: conv root weights then head linears
    hh_all = jnp.stack([p[3] for p in convs] +
                       [w for (w, _) in params['lins']])                   # [L+3, H, H]

    # row-vector slab: enc_b | conv biases | bn gammas | bn betas | lin biases
    rows = jnp.stack([params['enc_b']] +
                     [p[4] for p in convs] +
                     [g for (g, _) in params['bns']] +
                     [b for (_, b) in params['bns']] +
                     [b for (_, b) in params['lins']])                     # [15, 1, H]

    # gaussian coefficient matrix [2D+1, L*K]; rows: ea^2 coeffs | ea coeffs | constant
    mu = jnp.stack([p[1] for p in convs]).reshape(LK, D)
    sig = jnp.stack([p[2] for p in convs]).reshape(LK, D)
    is2 = 1.0 / (EPS_GMM + sig * sig)
    gauss_G = jnp.concatenate([
        0.5 * is2.T,                                                       # [D, LK]
        -(mu * is2).T,                                                     # [D, LK]
        (0.5 * jnp.sum(mu * mu * is2, axis=1))[None, :],                   # [1, LK]
    ], axis=0)                                                             # [2D+1, LK]

    # final Linear: weight rows then bias row
    fin = jnp.concatenate([params['fin_w'], params['fin_b']], axis=0)      # [H+1, O]

    # shape-only constants (numpy, converted once)
    rep_np = np.zeros((L, LK, KH), np.float32)
    for l in range(L):
        for k in range(K):
            rep_np[l, l * K + k, k * H:(k + 1) * H] = 1.0                  # layer-select + repeat
    sel_np = np.tile(np.eye(H, dtype=np.float32), (K, 1))                  # [K*H, H]

    return dict(enc_w=params['enc_w'], g_all=g_all, hh_all=hh_all, rows=rows,
                gauss_G=gauss_G, fin=fin,
                rep_all=jnp.asarray(rep_np), sel_S=jnp.asarray(sel_np),
                dims=dict(L=L, K=K, H=H, D=D))


# ----------------------------------------------------------------------------- wrapper
def forward_pallas(x_in, edge_index, edge_attr, batch, packed, num_graphs,
                   ends_in_sigmoid=False):
    N, F = x_in.shape
    E, D = edge_attr.shape
    L, K, H = packed['dims']['L'], packed['dims']['K'], packed['dims']['H']
    KH, LK = K * H, L * K
    O = packed['fin'].shape[1]
    B = num_graphs

    # Tiny per-call preprocessing (all other repacking lives in pack_params).
    ea_aug = jnp.concatenate([edge_attr * edge_attr, edge_attr,
                              jnp.ones((E, 1), jnp.float32)], axis=1)      # [E, 2D+1]
    src_col = edge_index[0].astype(jnp.int32)[:, None]                     # [E, 1]
    dst_row = edge_index[1].astype(jnp.int32)[None, :]                     # [1, E]
    bat_row = batch.astype(jnp.int32)[None, :]                             # [1, N]

    ops = (x_in, ea_aug, src_col, dst_row, bat_row,
           packed['enc_w'], packed['g_all'], packed['hh_all'], packed['rows'],
           packed['gauss_G'], packed['rep_all'], packed['sel_S'], packed['fin'])

    flops = 2 * (N * F * H + E * (2 * D + 1) * LK
                 + L * (N * H * KH + E * N * KH + E * LK * KH + E * KH * H
                        + N * E * H + N * H * H)
                 + B * N * H + 3 * B * H * H + B * H * O)
    transcendentals = E * LK + (L - 1) * N * H + 3 * B * H
    bytes_accessed = int(sum(a.size * a.dtype.itemsize for a in ops) + B * O * 4)

    return pl.pallas_call(
        functools.partial(_fused_kernel, num_layers=L,
                          ends_in_sigmoid=ends_in_sigmoid),
        grid=(1,),
        in_specs=[_full_spec(a.shape) for a in ops],
        out_specs=_full_spec((B, O)),
        out_shape=jax.ShapeDtypeStruct((B, O), jnp.float32),
        compiler_params=pltpu.CompilerParams(dimension_semantics=("arbitrary",)),
        cost_estimate=pl.CostEstimate(flops=flops, transcendentals=transcendentals,
                                      bytes_accessed=bytes_accessed),
    )(*ops)


# ----------------------------------------------------------------------------- reference
def _gmm_conv_ref(x, edge_index, edge_attr, p, N):
    g, mu, sigma, root_w, bias = p
    K, _ = mu.shape
    M = root_w.shape[1]
    h = (x @ g).reshape(N, K, M)
    src, dst = edge_index[0], edge_index[1]
    hj = h[src]
    diff = edge_attr[:, None, :] - mu[None, :, :]
    gauss = jnp.exp(jnp.sum(-0.5 * diff ** 2 / (EPS_GMM + sigma[None] ** 2), axis=-1))
    msg = jnp.sum(hj * gauss[:, :, None], axis=1)
    summed = jax.ops.segment_sum(msg, dst, num_segments=N)
    deg = jax.ops.segment_sum(jnp.ones((msg.shape[0],), jnp.float32), dst, num_segments=N)
    return summed / jnp.maximum(deg, 1.0)[:, None] + x @ root_w + bias


def _bn_ref(x, gamma, beta):
    mean = jnp.mean(x, axis=0, keepdims=True)
    var = jnp.mean((x - mean) ** 2, axis=0, keepdims=True)
    return (x - mean) / jnp.sqrt(var + EPS_BN) * gamma + beta


def forward_ref(x_in, edge_index, edge_attr, batch, params, num_graphs,
                ends_in_sigmoid=False):
    N = x_in.shape[0]
    x = x_in @ params['enc_w'] + params['enc_b']
    x = _gmm_conv_ref(x, edge_index, edge_attr, params['convs'][0], N)
    for p in params['convs'][1:]:
        x = jnp.tanh(x)
        x = _gmm_conv_ref(x, edge_index, edge_attr, p, N)
    pooled = jax.ops.segment_sum(x, batch, num_segments=num_graphs)
    for (g, be), (w, b) in zip(params['bns'][:3], params['lins']):
        pooled = _bn_ref(pooled, g, be)
        pooled = jnp.tanh(pooled @ w + b)
    pooled = _bn_ref(pooled, *params['bns'][3])
    out = pooled @ params['fin_w'] + params['fin_b']
    if ends_in_sigmoid:
        out = jax.nn.sigmoid(out)
    return out


# ----------------------------------------------------------------------------- params
def init_params(key, hidden, num_in, num_edge_attr, num_out, K=5):
    ks = iter(jax.random.split(key, 64))

    def nrm(shape, scale=0.1):
        return scale * jax.random.normal(next(ks), shape, dtype=jnp.float32)

    params = {
        'enc_w': nrm((num_in, hidden)),
        'enc_b': nrm((1, hidden)),
    }
    convs = []
    for _ in range(3):  # conv1 + 2 gcs, all GMMConv(hidden, hidden, dim=4, kernel_size=5)
        convs.append((
            nrm((hidden, K * hidden)),                    # g (columns ordered [k, m])
            nrm((K, num_edge_attr), 0.5),                 # mu
            jnp.ones((K, num_edge_attr), jnp.float32),    # sigma
            nrm((hidden, hidden)),                        # root weight ([in, out])
            nrm((1, hidden)),                             # bias
        ))
    params['convs'] = convs
    params['bns'] = [(1.0 + nrm((1, hidden)), nrm((1, hidden))) for _ in range(4)]
    params['lins'] = [(nrm((hidden, hidden)), nrm((1, hidden))) for _ in range(3)]
    params['fin_w'] = nrm((hidden, num_out))
    params['fin_b'] = nrm((1, num_out))
    return params


# ----------------------------------------------------------------------------- main
if __name__ == "__main__":
    hidden_channels = 32
    num_input_features = 8
    num_edge_attr = 4          # must equal GMMConv dim (=4): edge_attr are pseudo-coords
    num_output_features = 2
    N, E, B = 16, 32, 2
    ends_in_sigmoid = False

    key = jax.random.PRNGKey(0)
    k_par, k_x, k_src, k_dst, k_ea = jax.random.split(key, 5)

    params = init_params(k_par, hidden_channels, num_input_features,
                         num_edge_attr, num_output_features)
    packed = pack_params(params)           # one-time param repacking (off the hot path)

    x = jax.random.normal(k_x, (N, num_input_features), dtype=jnp.float32)
    edge_index = jnp.stack([
        jax.random.randint(k_src, (E,), 0, N),
        jax.random.randint(k_dst, (E,), 0, N),
    ]).astype(jnp.int32)                                            # [2, E]
    edge_attr = jax.random.uniform(k_ea, (E, num_edge_attr), dtype=jnp.float32)
    batch = jnp.concatenate([jnp.zeros((N // 2,), jnp.int32),
                             jnp.ones((N - N // 2,), jnp.int32)])   # [N]

    out = forward_pallas(x, edge_index, edge_attr, batch, packed, B, ends_in_sigmoid)
    out = jax.block_until_ready(out)

    ref = forward_ref(x, edge_index, edge_attr, batch, params, B, ends_in_sigmoid)
    np.testing.assert_allclose(np.asarray(out), np.asarray(ref), rtol=1e-3, atol=1e-3)
    assert out.shape == (B, num_output_features)
    assert bool(jnp.all(jnp.isfinite(out)))

    print("KERNEL_OK")
</pallas_src>

<mosaic_0001>
module attributes {stable_mosaic.version = 11 : i64} {
  func.func @_fused_kernel(%arg0: i32, %arg1: memref<16x8xf32, #tpu.memory_space<vmem>>, %arg2: memref<32x9xf32, #tpu.memory_space<vmem>>, %arg3: memref<32x1xi32, #tpu.memory_space<vmem>>, %arg4: memref<1x32xi32, #tpu.memory_space<vmem>>, %arg5: memref<1x16xi32, #tpu.memory_space<vmem>>, %arg6: memref<8x32xf32, #tpu.memory_space<vmem>>, %arg7: memref<3x32x160xf32, #tpu.memory_space<vmem>>, %arg8: memref<6x32x32xf32, #tpu.memory_space<vmem>>, %arg9: memref<15x1x32xf32, #tpu.memory_space<vmem>>, %arg10: memref<9x15xf32, #tpu.memory_space<vmem>>, %arg11: memref<3x15x160xf32, #tpu.memory_space<vmem>>, %arg12: memref<160x32xf32, #tpu.memory_space<vmem>>, %arg13: memref<33x2xf32, #tpu.memory_space<vmem>>, %arg14: memref<2x2xf32, #tpu.memory_space<vmem>>) attributes {dimension_semantics = [#tpu.dimension_semantics<arbitrary>], iteration_bounds = array<i64: 1>, scalar_prefetch = 0 : i64, scratch_operands = 0 : i64, tpu.core_type = #tpu.core_type<tc>, window_params = [{pipeline_mode = #tpu.pipeline_mode<synchronous>, transform_indices = @transform_0, window_bounds = array<i64: 16, 8>}, {pipeline_mode = #tpu.pipeline_mode<synchronous>, transform_indices = @transform_1, window_bounds = array<i64: 32, 9>}, {pipeline_mode = #tpu.pipeline_mode<synchronous>, transform_indices = @transform_2, window_bounds = array<i64: 32, 1>}, {pipeline_mode = #tpu.pipeline_mode<synchronous>, transform_indices = @transform_3, window_bounds = array<i64: 1, 32>}, {pipeline_mode = #tpu.pipeline_mode<synchronous>, transform_indices = @transform_4, window_bounds = array<i64: 1, 16>}, {pipeline_mode = #tpu.pipeline_mode<synchronous>, transform_indices = @transform_5, window_bounds = array<i64: 8, 32>}, {pipeline_mode = #tpu.pipeline_mode<synchronous>, transform_indices = @transform_6, window_bounds = array<i64: 3, 32, 160>}, {pipeline_mode = #tpu.pipeline_mode<synchronous>, transform_indices = @transform_7, window_bounds = array<i64: 6, 32, 32>}, {pipeline_mode = #tpu.pipeline_mode<synchronous>, transform_indices = @transform_8, window_bounds = array<i64: 15, 1, 32>}, {pipeline_mode = #tpu.pipeline_mode<synchronous>, transform_indices = @transform_9, window_bounds = array<i64: 9, 15>}, {pipeline_mode = #tpu.pipeline_mode<synchronous>, transform_indices = @transform_10, window_bounds = array<i64: 3, 15, 160>}, {pipeline_mode = #tpu.pipeline_mode<synchronous>, transform_indices = @transform_11, window_bounds = array<i64: 160, 32>}, {pipeline_mode = #tpu.pipeline_mode<synchronous>, transform_indices = @transform_12, window_bounds = array<i64: 33, 2>}, {pipeline_mode = #tpu.pipeline_mode<synchronous>, transform_indices = @transform_13, window_bounds = array<i64: 2, 2>}]} {
    %0 = tpu.iota {dimensions = array<i32: 1>} : vector<32x16xi32>
    %c0 = arith.constant 0 : index
    %c0_0 = arith.constant 0 : index
    %1 = vector.load %arg3[%c0, %c0_0] : memref<32x1xi32, #tpu.memory_space<vmem>>, vector<32x1xi32>
    %2 = vector.broadcast %1 : vector<32x1xi32> to vector<32x16xi32>
    %3 = arith.cmpi eq, %2, %0 : vector<32x16xi32>
    %4 = arith.extui %3 : vector<32x16xi1> to vector<32x16xi32>
    %5 = arith.sitofp %4 : vector<32x16xi32> to vector<32x16xf32>
    %6 = tpu.iota {dimensions = array<i32: 0>} : vector<16x32xi32>
    %c0_1 = arith.constant 0 : index
    %c0_2 = arith.constant 0 : index
    %7 = vector.load %arg4[%c0_1, %c0_2] : memref<1x32xi32, #tpu.memory_space<vmem>>, vector<1x32xi32>
    %8 = vector.broadcast %7 : vector<1x32xi32> to vector<16x32xi32>
    %9 = arith.cmpi eq, %6, %8 : vector<16x32xi32>
    %10 = arith.extui %9 : vector<16x32xi1> to vector<16x32xi32>
    %11 = arith.sitofp %10 : vector<16x32xi32> to vector<16x32xf32>
    %12 = tpu.iota {dimensions = array<i32: 0>} : vector<2x16xi32>
    %c0_3 = arith.constant 0 : index
    %c0_4 = arith.constant 0 : index
    %13 = vector.load %arg5[%c0_3, %c0_4] : memref<1x16xi32, #tpu.memory_space<vmem>>, vector<1x16xi32>
    %14 = vector.broadcast %13 : vector<1x16xi32> to vector<2x16xi32>
    %15 = arith.cmpi eq, %12, %14 : vector<2x16xi32>
    %16 = arith.extui %15 : vector<2x16xi1> to vector<2x16xi32>
    %17 = arith.sitofp %16 : vector<2x16xi32> to vector<2x16xf32>
    %cst = arith.constant dense<0.000000e+00> : vector<16xf32>
    %18 = vector.multi_reduction <add>, %11, %cst [1] : vector<16x32xf32> to vector<16xf32>
    %19 = vector.shape_cast %18 : vector<16xf32> to vector<16x1xf32>
    %cst_5 = arith.constant 1.000000e+00 : f32
    %20 = vector.broadcast %cst_5 : f32 to vector<16x1xf32>
    %21 = arith.maximumf %19, %20 : vector<16x1xf32>
    %cst_6 = arith.constant 1.000000e+00 : f32
    %22 = vector.broadcast %cst_6 : f32 to vector<16x1xf32>
    %23 = arith.divf %22, %21 : vector<16x1xf32>
    %c0_7 = arith.constant 0 : index
    %c0_8 = arith.constant 0 : index
    %24 = vector.load %arg2[%c0_7, %c0_8] : memref<32x9xf32, #tpu.memory_space<vmem>>, vector<32x9xf32>
    %c0_9 = arith.constant 0 : index
    %c0_10 = arith.constant 0 : index
    %25 = vector.load %arg10[%c0_9, %c0_10] : memref<9x15xf32, #tpu.memory_space<vmem>>, vector<9x15xf32>
    %cst_11 = arith.constant dense<0.000000e+00> : vector<32x15xf32>
    %26 = tpu.matmul %24, %25, %cst_11 {dimension_numbers = #tpu.dot_dimension_numbers<[1], [0], [0], [1], [0, 0, 1, 1], [], []>} : vector<32x9xf32>, vector<9x15xf32>, vector<32x15xf32> -> vector<32x15xf32>
    %cst_12 = arith.constant 0.000000e+00 : f32
    %27 = vector.broadcast %cst_12 : f32 to vector<32x15xf32>
    %28 = arith.subf %27, %26 : vector<32x15xf32>
    %29 = math.exp %28 : vector<32x15xf32>
    %c0_13 = arith.constant 0 : index
    %c0_14 = arith.constant 0 : index
    %30 = vector.load %arg12[%c0_13, %c0_14] : memref<160x32xf32, #tpu.memory_space<vmem>>, vector<160x32xf32>
    %c0_15 = arith.constant 0 : index
    %c0_16 = arith.constant 0 : index
    %31 = vector.load %arg1[%c0_15, %c0_16] : memref<16x8xf32, #tpu.memory_space<vmem>>, vector<16x8xf32>
    %c0_17 = arith.constant 0 : index
    %c0_18 = arith.constant 0 : index
    %32 = vector.load %arg6[%c0_17, %c0_18] : memref<8x32xf32, #tpu.memory_space<vmem>>, vector<8x32xf32>
    %cst_19 = arith.constant dense<0.000000e+00> : vector<16x32xf32>
    %33 = tpu.matmul %31, %32, %cst_19 {dimension_numbers = #tpu.dot_dimension_numbers<[1], [0], [0], [1], [0, 0, 1, 1], [], []>} : vector<16x8xf32>, vector<8x32xf32>, vector<16x32xf32> -> vector<16x32xf32>
    %c0_20 = arith.constant 0 : index
    %c0_21 = arith.constant 0 : index
    %c0_22 = arith.constant 0 : index
    %34 = vector.load %arg9[%c0_20, %c0_21, %c0_22] : memref<15x1x32xf32, #tpu.memory_space<vmem>>, vector<1x1x32xf32>
    %35 = vector.shape_cast %34 : vector<1x1x32xf32> to vector<1x32xf32>
    %36 = vector.broadcast %35 : vector<1x32xf32> to vector<16x32xf32>
    %37 = arith.addf %33, %36 : vector<16x32xf32>
    %c0_23 = arith.constant 0 : index
    %c0_24 = arith.constant 0 : index
    %c0_25 = arith.constant 0 : index
    %38 = vector.load %arg7[%c0_23, %c0_24, %c0_25] : memref<3x32x160xf32, #tpu.memory_space<vmem>>, vector<1x32x160xf32>
    %39 = vector.shape_cast %38 : vector<1x32x160xf32> to vector<32x160xf32>
    %cst_26 = arith.constant dense<0.000000e+00> : vector<16x160xf32>
    %40 = tpu.matmul %37, %39, %cst_26 {dimension_numbers = #tpu.dot_dimension_numbers<[1], [0], [0], [1], [0, 0, 1, 1], [], []>} : vector<16x32xf32>, vector<32x160xf32>, vector<16x160xf32> -> vector<16x160xf32>
    %cst_27 = arith.constant dense<0.000000e+00> : vector<32x160xf32>
    %41 = tpu.matmul %5, %40, %cst_27 {dimension_numbers = #tpu.dot_dimension_numbers<[1], [0], [0], [1], [0, 0, 1, 1], [], []>} : vector<32x16xf32>, vector<16x160xf32>, vector<32x160xf32> -> vector<32x160xf32>
    %c0_28 = arith.constant 0 : index
    %c0_29 = arith.constant 0 : index
    %c0_30 = arith.constant 0 : index
    %42 = vector.load %arg11[%c0_28, %c0_29, %c0_30] : memref<3x15x160xf32, #tpu.memory_space<vmem>>, vector<1x15x160xf32>
    %43 = vector.shape_cast %42 : vector<1x15x160xf32> to vector<15x160xf32>
    %cst_31 = arith.constant dense<0.000000e+00> : vector<32x160xf32>
    %44 = tpu.matmul %29, %43, %cst_31 {dimension_numbers = #tpu.dot_dimension_numbers<[1], [0], [0], [1], [0, 0, 1, 1], [], []>} : vector<32x15xf32>, vector<15x160xf32>, vector<32x160xf32> -> vector<32x160xf32>
    %45 = arith.mulf %41, %44 : vector<32x160xf32>
    %cst_32 = arith.constant dense<0.000000e+00> : vector<32x32xf32>
    %46 = tpu.matmul %45, %30, %cst_32 {dimension_numbers = #tpu.dot_dimension_numbers<[1], [0], [0], [1], [0, 0, 1, 1], [], []>} : vector<32x160xf32>, vector<160x32xf32>, vector<32x32xf32> -> vector<32x32xf32>
    %cst_33 = arith.constant dense<0.000000e+00> : vector<16x32xf32>
    %47 = tpu.matmul %11, %46, %cst_33 {dimension_numbers = #tpu.dot_dimension_numbers<[1], [0], [0], [1], [0, 0, 1, 1], [], []>} : vector<16x32xf32>, vector<32x32xf32>, vector<16x32xf32> -> vector<16x32xf32>
    %48 = vector.broadcast %23 : vector<16x1xf32> to vector<16x32xf32>
    %49 = arith.mulf %47, %48 : vector<16x32xf32>
    %c0_34 = arith.constant 0 : index
    %c0_35 = arith.constant 0 : index
    %c0_36 = arith.constant 0 : index
    %50 = vector.load %arg8[%c0_34, %c0_35, %c0_36] : memref<6x32x32xf32, #tpu.memory_space<vmem>>, vector<1x32x32xf32>
    %51 = vector.shape_cast %50 : vector<1x32x32xf32> to vector<32x32xf32>
    %cst_37 = arith.constant dense<0.000000e+00> : vector<16x32xf32>
    %52 = tpu.matmul %37, %51, %cst_37 {dimension_numbers = #tpu.dot_dimension_numbers<[1], [0], [0], [1], [0, 0, 1, 1], [], []>} : vector<16x32xf32>, vector<32x32xf32>, vector<16x32xf32> -> vector<16x32xf32>
    %53 = arith.addf %49, %52 : vector<16x32xf32>
    %c1 = arith.constant 1 : index
    %c0_38 = arith.constant 0 : index
    %c0_39 = arith.constant 0 : index
    %54 = vector.load %arg9[%c1, %c0_38, %c0_39] : memref<15x1x32xf32, #tpu.memory_space<vmem>>, vector<1x1x32xf32>
    %55 = vector.shape_cast %54 : vector<1x1x32xf32> to vector<1x32xf32>
    %56 = vector.broadcast %55 : vector<1x32xf32> to vector<16x32xf32>
    %57 = arith.addf %53, %56 : vector<16x32xf32>
    %58 = math.tanh %57 : vector<16x32xf32>
    %c1_40 = arith.constant 1 : index
    %c0_41 = arith.constant 0 : index
    %c0_42 = arith.constant 0 : index
    %59 = vector.load %arg7[%c1_40, %c0_41, %c0_42] : memref<3x32x160xf32, #tpu.memory_space<vmem>>, vector<1x32x160xf32>
    %60 = vector.shape_cast %59 : vector<1x32x160xf32> to vector<32x160xf32>
    %cst_43 = arith.constant dense<0.000000e+00> : vector<16x160xf32>
    %61 = tpu.matmul %58, %60, %cst_43 {dimension_numbers = #tpu.dot_dimension_numbers<[1], [0], [0], [1], [0, 0, 1, 1], [], []>} : vector<16x32xf32>, vector<32x160xf32>, vector<16x160xf32> -> vector<16x160xf32>
    %cst_44 = arith.constant dense<0.000000e+00> : vector<32x160xf32>
    %62 = tpu.matmul %5, %61, %cst_44 {dimension_numbers = #tpu.dot_dimension_numbers<[1], [0], [0], [1], [0, 0, 1, 1], [], []>} : vector<32x16xf32>, vector<16x160xf32>, vector<32x160xf32> -> vector<32x160xf32>
    %c1_45 = arith.constant 1 : index
    %c0_46 = arith.constant 0 : index
    %c0_47 = arith.constant 0 : index
    %63 = vector.load %arg11[%c1_45, %c0_46, %c0_47] : memref<3x15x160xf32, #tpu.memory_space<vmem>>, vector<1x15x160xf32>
    %64 = vector.shape_cast %63 : vector<1x15x160xf32> to vector<15x160xf32>
    %cst_48 = arith.constant dense<0.000000e+00> : vector<32x160xf32>
    %65 = tpu.matmul %29, %64, %cst_48 {dimension_numbers = #tpu.dot_dimension_numbers<[1], [0], [0], [1], [0, 0, 1, 1], [], []>} : vector<32x15xf32>, vector<15x160xf32>, vector<32x160xf32> -> vector<32x160xf32>
    %66 = arith.mulf %62, %65 : vector<32x160xf32>
    %cst_49 = arith.constant dense<0.000000e+00> : vector<32x32xf32>
    %67 = tpu.matmul %66, %30, %cst_49 {dimension_numbers = #tpu.dot_dimension_numbers<[1], [0], [0], [1], [0, 0, 1, 1], [], []>} : vector<32x160xf32>, vector<160x32xf32>, vector<32x32xf32> -> vector<32x32xf32>
    %cst_50 = arith.constant dense<0.000000e+00> : vector<16x32xf32>
    %68 = tpu.matmul %11, %67, %cst_50 {dimension_numbers = #tpu.dot_dimension_numbers<[1], [0], [0], [1], [0, 0, 1, 1], [], []>} : vector<16x32xf32>, vector<32x32xf32>, vector<16x32xf32> -> vector<16x32xf32>
    %69 = vector.broadcast %23 : vector<16x1xf32> to vector<16x32xf32>
    %70 = arith.mulf %68, %69 : vector<16x32xf32>
    %c1_51 = arith.constant 1 : index
    %c0_52 = arith.constant 0 : index
    %c0_53 = arith.constant 0 : index
    %71 = vector.load %arg8[%c1_51, %c0_52, %c0_53] : memref<6x32x32xf32, #tpu.memory_space<vmem>>, vector<1x32x32xf32>
    %72 = vector.shape_cast %71 : vector<1x32x32xf32> to vector<32x32xf32>
    %cst_54 = arith.constant dense<0.000000e+00> : vector<16x32xf32>
    %73 = tpu.matmul %58, %72, %cst_54 {dimension_numbers = #tpu.dot_dimension_numbers<[1], [0], [0], [1], [0, 0, 1, 1], [], []>} : vector<16x32xf32>, vector<32x32xf32>, vector<16x32xf32> -> vector<16x32xf32>
    %74 = arith.addf %70, %73 : vector<16x32xf32>
    %c2 = arith.constant 2 : index
    %c0_55 = arith.constant 0 : index
    %c0_56 = arith.constant 0 : index
    %75 = vector.load %arg9[%c2, %c0_55, %c0_56] : memref<15x1x32xf32, #tpu.memory_space<vmem>>, vector<1x1x32xf32>
    %76 = vector.shape_cast %75 : vector<1x1x32xf32> to vector<1x32xf32>
    %77 = vector.broadcast %76 : vector<1x32xf32> to vector<16x32xf32>
    %78 = arith.addf %74, %77 : vector<16x32xf32>
    %79 = math.tanh %78 : vector<16x32xf32>
    %c2_57 = arith.constant 2 : index
    %c0_58 = arith.constant 0 : index
    %c0_59 = arith.constant 0 : index
    %80 = vector.load %arg7[%c2_57, %c0_58, %c0_59] : memref<3x32x160xf32, #tpu.memory_space<vmem>>, vector<1x32x160xf32>
    %81 = vector.shape_cast %80 : vector<1x32x160xf32> to vector<32x160xf32>
    %cst_60 = arith.constant dense<0.000000e+00> : vector<16x160xf32>
    %82 = tpu.matmul %79, %81, %cst_60 {dimension_numbers = #tpu.dot_dimension_numbers<[1], [0], [0], [1], [0, 0, 1, 1], [], []>} : vector<16x32xf32>, vector<32x160xf32>, vector<16x160xf32> -> vector<16x160xf32>
    %cst_61 = arith.constant dense<0.000000e+00> : vector<32x160xf32>
    %83 = tpu.matmul %5, %82, %cst_61 {dimension_numbers = #tpu.dot_dimension_numbers<[1], [0], [0], [1], [0, 0, 1, 1], [], []>} : vector<32x16xf32>, vector<16x160xf32>, vector<32x160xf32> -> vector<32x160xf32>
    %c2_62 = arith.constant 2 : index
    %c0_63 = arith.constant 0 : index
    %c0_64 = arith.constant 0 : index
    %84 = vector.load %arg11[%c2_62, %c0_63, %c0_64] : memref<3x15x160xf32, #tpu.memory_space<vmem>>, vector<1x15x160xf32>
    %85 = vector.shape_cast %84 : vector<1x15x160xf32> to vector<15x160xf32>
    %cst_65 = arith.constant dense<0.000000e+00> : vector<32x160xf32>
    %86 = tpu.matmul %29, %85, %cst_65 {dimension_numbers = #tpu.dot_dimension_numbers<[1], [0], [0], [1], [0, 0, 1, 1], [], []>} : vector<32x15xf32>, vector<15x160xf32>, vector<32x160xf32> -> vector<32x160xf32>
    %87 = arith.mulf %83, %86 : vector<32x160xf32>
    %cst_66 = arith.constant dense<0.000000e+00> : vector<32x32xf32>
    %88 = tpu.matmul %87, %30, %cst_66 {dimension_numbers = #tpu.dot_dimension_numbers<[1], [0], [0], [1], [0, 0, 1, 1], [], []>} : vector<32x160xf32>, vector<160x32xf32>, vector<32x32xf32> -> vector<32x32xf32>
    %cst_67 = arith.constant dense<0.000000e+00> : vector<16x32xf32>
    %89 = tpu.matmul %11, %88, %cst_67 {dimension_numbers = #tpu.dot_dimension_numbers<[1], [0], [0], [1], [0, 0, 1, 1], [], []>} : vector<16x32xf32>, vector<32x32xf32>, vector<16x32xf32> -> vector<16x32xf32>
    %90 = vector.broadcast %23 : vector<16x1xf32> to vector<16x32xf32>
    %91 = arith.mulf %89, %90 : vector<16x32xf32>
    %c2_68 = arith.constant 2 : index
    %c0_69 = arith.constant 0 : index
    %c0_70 = arith.constant 0 : index
    %92 = vector.load %arg8[%c2_68, %c0_69, %c0_70] : memref<6x32x32xf32, #tpu.memory_space<vmem>>, vector<1x32x32xf32>
    %93 = vector.shape_cast %92 : vector<1x32x32xf32> to vector<32x32xf32>
    %cst_71 = arith.constant dense<0.000000e+00> : vector<16x32xf32>
    %94 = tpu.matmul %79, %93, %cst_71 {dimension_numbers = #tpu.dot_dimension_numbers<[1], [0], [0], [1], [0, 0, 1, 1], [], []>} : vector<16x32xf32>, vector<32x32xf32>, vector<16x32xf32> -> vector<16x32xf32>
    %95 = arith.addf %91, %94 : vector<16x32xf32>
    %c3 = arith.constant 3 : index
    %c0_72 = arith.constant 0 : index
    %c0_73 = arith.constant 0 : index
    %96 = vector.load %arg9[%c3, %c0_72, %c0_73] : memref<15x1x32xf32, #tpu.memory_space<vmem>>, vector<1x1x32xf32>
    %97 = vector.shape_cast %96 : vector<1x1x32xf32> to vector<1x32xf32>
    %98 = vector.broadcast %97 : vector<1x32xf32> to vector<16x32xf32>
    %99 = arith.addf %95, %98 : vector<16x32xf32>
    %cst_74 = arith.constant dense<0.000000e+00> : vector<2x32xf32>
    %100 = tpu.matmul %17, %99, %cst_74 {dimension_numbers = #tpu.dot_dimension_numbers<[1], [0], [0], [1], [0, 0, 1, 1], [], []>} : vector<2x16xf32>, vector<16x32xf32>, vector<2x32xf32> -> vector<2x32xf32>
    %cst_75 = arith.constant dense<0.000000e+00> : vector<32xf32>
    %101 = vector.multi_reduction <add>, %100, %cst_75 [0] : vector<2x32xf32> to vector<32xf32>
    %102 = vector.shape_cast %101 : vector<32xf32> to vector<1x32xf32>
    %cst_76 = arith.constant 2.000000e+00 : f32
    %103 = vector.broadcast %cst_76 : f32 to vector<1x32xf32>
    %104 = arith.divf %102, %103 : vector<1x32xf32>
    %105 = vector.broadcast %104 : vector<1x32xf32> to vector<2x32xf32>
    %106 = arith.subf %100, %105 : vector<2x32xf32>
    %107 = arith.mulf %106, %106 : vector<2x32xf32>
    %cst_77 = arith.constant dense<0.000000e+00> : vector<32xf32>
    %108 = vector.multi_reduction <add>, %107, %cst_77 [0] : vector<2x32xf32> to vector<32xf32>
    %109 = vector.shape_cast %108 : vector<32xf32> to vector<1x32xf32>
    %cst_78 = arith.constant 2.000000e+00 : f32
    %110 = vector.broadcast %cst_78 : f32 to vector<1x32xf32>
    %111 = arith.divf %109, %110 : vector<1x32xf32>
    %112 = vector.broadcast %104 : vector<1x32xf32> to vector<2x32xf32>
    %113 = arith.subf %100, %112 : vector<2x32xf32>
    %cst_79 = arith.constant 9.99999974E-6 : f32
    %114 = vector.broadcast %cst_79 : f32 to vector<1x32xf32>
    %115 = arith.addf %111, %114 : vector<1x32xf32>
    %116 = math.rsqrt %115 : vector<1x32xf32>
    %117 = vector.broadcast %116 : vector<1x32xf32> to vector<2x32xf32>
    %118 = arith.mulf %113, %117 : vector<2x32xf32>
    %c4 = arith.constant 4 : index
    %c0_80 = arith.constant 0 : index
    %c0_81 = arith.constant 0 : index
    %119 = vector.load %arg9[%c4, %c0_80, %c0_81] : memref<15x1x32xf32, #tpu.memory_space<vmem>>, vector<1x1x32xf32>
    %120 = vector.shape_cast %119 : vector<1x1x32xf32> to vector<1x32xf32>
    %121 = vector.broadcast %120 : vector<1x32xf32> to vector<2x32xf32>
    %122 = arith.mulf %118, %121 : vector<2x32xf32>
    %c8 = arith.constant 8 : index
    %c0_82 = arith.constant 0 : index
    %c0_83 = arith.constant 0 : index
    %123 = vector.load %arg9[%c8, %c0_82, %c0_83] : memref<15x1x32xf32, #tpu.memory_space<vmem>>, vector<1x1x32xf32>
    %124 = vector.shape_cast %123 : vector<1x1x32xf32> to vector<1x32xf32>
    %125 = vector.broadcast %124 : vector<1x32xf32> to vector<2x32xf32>
    %126 = arith.addf %122, %125 : vector<2x32xf32>
    %c3_84 = arith.constant 3 : index
    %c0_85 = arith.constant 0 : index
    %c0_86 = arith.constant 0 : index
    %127 = vector.load %arg8[%c3_84, %c0_85, %c0_86] : memref<6x32x32xf32, #tpu.memory_space<vmem>>, vector<1x32x32xf32>
    %128 = vector.shape_cast %127 : vector<1x32x32xf32> to vector<32x32xf32>
    %cst_87 = arith.constant dense<0.000000e+00> : vector<2x32xf32>
    %129 = tpu.matmul %126, %128, %cst_87 {dimension_numbers = #tpu.dot_dimension_numbers<[1], [0], [0], [1], [0, 0, 1, 1], [], []>} : vector<2x32xf32>, vector<32x32xf32>, vector<2x32xf32> -> vector<2x32xf32>
    %c12 = arith.constant 12 : index
    %c0_88 = arith.constant 0 : index
    %c0_89 = arith.constant 0 : index
    %130 = vector.load %arg9[%c12, %c0_88, %c0_89] : memref<15x1x32xf32, #tpu.memory_space<vmem>>, vector<1x1x32xf32>
    %131 = vector.shape_cast %130 : vector<1x1x32xf32> to vector<1x32xf32>
    %132 = vector.broadcast %131 : vector<1x32xf32> to vector<2x32xf32>
    %133 = arith.addf %129, %132 : vector<2x32xf32>
    %134 = math.tanh %133 : vector<2x32xf32>
    %cst_90 = arith.constant dense<0.000000e+00> : vector<32xf32>
    %135 = vector.multi_reduction <add>, %134, %cst_90 [0] : vector<2x32xf32> to vector<32xf32>
    %136 = vector.shape_cast %135 : vector<32xf32> to vector<1x32xf32>
    %cst_91 = arith.constant 2.000000e+00 : f32
    %137 = vector.broadcast %cst_91 : f32 to vector<1x32xf32>
    %138 = arith.divf %136, %137 : vector<1x32xf32>
    %139 = vector.broadcast %138 : vector<1x32xf32> to vector<2x32xf32>
    %140 = arith.subf %134, %139 : vector<2x32xf32>
    %141 = arith.mulf %140, %140 : vector<2x32xf32>
    %cst_92 = arith.constant dense<0.000000e+00> : vector<32xf32>
    %142 = vector.multi_reduction <add>, %141, %cst_92 [0] : vector<2x32xf32> to vector<32xf32>
    %143 = vector.shape_cast %142 : vector<32xf32> to vector<1x32xf32>
    %cst_93 = arith.constant 2.000000e+00 : f32
    %144 = vector.broadcast %cst_93 : f32 to vector<1x32xf32>
    %145 = arith.divf %143, %144 : vector<1x32xf32>
    %146 = vector.broadcast %138 : vector<1x32xf32> to vector<2x32xf32>
    %147 = arith.subf %134, %146 : vector<2x32xf32>
    %cst_94 = arith.constant 9.99999974E-6 : f32
    %148 = vector.broadcast %cst_94 : f32 to vector<1x32xf32>
    %149 = arith.addf %145, %148 : vector<1x32xf32>
    %150 = math.rsqrt %149 : vector<1x32xf32>
    %151 = vector.broadcast %150 : vector<1x32xf32> to vector<2x32xf32>
    %152 = arith.mulf %147, %151 : vector<2x32xf32>
    %c5 = arith.constant 5 : index
    %c0_95 = arith.constant 0 : index
    %c0_96 = arith.constant 0 : index
    %153 = vector.load %arg9[%c5, %c0_95, %c0_96] : memref<15x1x32xf32, #tpu.memory_space<vmem>>, vector<1x1x32xf32>
    %154 = vector.shape_cast %153 : vector<1x1x32xf32> to vector<1x32xf32>
    %155 = vector.broadcast %154 : vector<1x32xf32> to vector<2x32xf32>
    %156 = arith.mulf %152, %155 : vector<2x32xf32>
    %c9 = arith.constant 9 : index
    %c0_97 = arith.constant 0 : index
    %c0_98 = arith.constant 0 : index
    %157 = vector.load %arg9[%c9, %c0_97, %c0_98] : memref<15x1x32xf32, #tpu.memory_space<vmem>>, vector<1x1x32xf32>
    %158 = vector.shape_cast %157 : vector<1x1x32xf32> to vector<1x32xf32>
    %159 = vector.broadcast %158 : vector<1x32xf32> to vector<2x32xf32>
    %160 = arith.addf %156, %159 : vector<2x32xf32>
    %c4_99 = arith.constant 4 : index
    %c0_100 = arith.constant 0 : index
    %c0_101 = arith.constant 0 : index
    %161 = vector.load %arg8[%c4_99, %c0_100, %c0_101] : memref<6x32x32xf32, #tpu.memory_space<vmem>>, vector<1x32x32xf32>
    %162 = vector.shape_cast %161 : vector<1x32x32xf32> to vector<32x32xf32>
    %cst_102 = arith.constant dense<0.000000e+00> : vector<2x32xf32>
    %163 = tpu.matmul %160, %162, %cst_102 {dimension_numbers = #tpu.dot_dimension_numbers<[1], [0], [0], [1], [0, 0, 1, 1], [], []>} : vector<2x32xf32>, vector<32x32xf32>, vector<2x32xf32> -> vector<2x32xf32>
    %c13 = arith.constant 13 : index
    %c0_103 = arith.constant 0 : index
    %c0_104 = arith.constant 0 : index
    %164 = vector.load %arg9[%c13, %c0_103, %c0_104] : memref<15x1x32xf32, #tpu.memory_space<vmem>>, vector<1x1x32xf32>
    %165 = vector.shape_cast %164 : vector<1x1x32xf32> to vector<1x32xf32>
    %166 = vector.broadcast %165 : vector<1x32xf32> to vector<2x32xf32>
    %167 = arith.addf %163, %166 : vector<2x32xf32>
    %168 = math.tanh %167 : vector<2x32xf32>
    %cst_105 = arith.constant dense<0.000000e+00> : vector<32xf32>
    %169 = vector.multi_reduction <add>, %168, %cst_105 [0] : vector<2x32xf32> to vector<32xf32>
    %170 = vector.shape_cast %169 : vector<32xf32> to vector<1x32xf32>
    %cst_106 = arith.constant 2.000000e+00 : f32
    %171 = vector.broadcast %cst_106 : f32 to vector<1x32xf32>
    %172 = arith.divf %170, %171 : vector<1x32xf32>
    %173 = vector.broadcast %172 : vector<1x32xf32> to vector<2x32xf32>
    %174 = arith.subf %168, %173 : vector<2x32xf32>
    %175 = arith.mulf %174, %174 : vector<2x32xf32>
    %cst_107 = arith.constant dense<0.000000e+00> : vector<32xf32>
    %176 = vector.multi_reduction <add>, %175, %cst_107 [0] : vector<2x32xf32> to vector<32xf32>
    %177 = vector.shape_cast %176 : vector<32xf32> to vector<1x32xf32>
    %cst_108 = arith.constant 2.000000e+00 : f32
    %178 = vector.broadcast %cst_108 : f32 to vector<1x32xf32>
    %179 = arith.divf %177, %178 : vector<1x32xf32>
    %180 = vector.broadcast %172 : vector<1x32xf32> to vector<2x32xf32>
    %181 = arith.subf %168, %180 : vector<2x32xf32>
    %cst_109 = arith.constant 9.99999974E-6 : f32
    %182 = vector.broadcast %cst_109 : f32 to vector<1x32xf32>
    %183 = arith.addf %179, %182 : vector<1x32xf32>
    %184 = math.rsqrt %183 : vector<1x32xf32>
    %185 = vector.broadcast %184 : vector<1x32xf32> to vector<2x32xf32>
    %186 = arith.mulf %181, %185 : vector<2x32xf32>
    %c6 = arith.constant 6 : index
    %c0_110 = arith.constant 0 : index
    %c0_111 = arith.constant 0 : index
    %187 = vector.load %arg9[%c6, %c0_110, %c0_111] : memref<15x1x32xf32, #tpu.memory_space<vmem>>, vector<1x1x32xf32>
    %188 = vector.shape_cast %187 : vector<1x1x32xf32> to vector<1x32xf32>
    %189 = vector.broadcast %188 : vector<1x32xf32> to vector<2x32xf32>
    %190 = arith.mulf %186, %189 : vector<2x32xf32>
    %c10 = arith.constant 10 : index
    %c0_112 = arith.constant 0 : index
    %c0_113 = arith.constant 0 : index
    %191 = vector.load %arg9[%c10, %c0_112, %c0_113] : memref<15x1x32xf32, #tpu.memory_space<vmem>>, vector<1x1x32xf32>
    %192 = vector.shape_cast %191 : vector<1x1x32xf32> to vector<1x32xf32>
    %193 = vector.broadcast %192 : vector<1x32xf32> to vector<2x32xf32>
    %194 = arith.addf %190, %193 : vector<2x32xf32>
    %c5_114 = arith.constant 5 : index
    %c0_115 = arith.constant 0 : index
    %c0_116 = arith.constant 0 : index
    %195 = vector.load %arg8[%c5_114, %c0_115, %c0_116] : memref<6x32x32xf32, #tpu.memory_space<vmem>>, vector<1x32x32xf32>
    %196 = vector.shape_cast %195 : vector<1x32x32xf32> to vector<32x32xf32>
    %cst_117 = arith.constant dense<0.000000e+00> : vector<2x32xf32>
    %197 = tpu.matmul %194, %196, %cst_117 {dimension_numbers = #tpu.dot_dimension_numbers<[1], [0], [0], [1], [0, 0, 1, 1], [], []>} : vector<2x32xf32>, vector<32x32xf32>, vector<2x32xf32> -> vector<2x32xf32>
    %c14 = arith.constant 14 : index
    %c0_118 = arith.constant 0 : index
    %c0_119 = arith.constant 0 : index
    %198 = vector.load %arg9[%c14, %c0_118, %c0_119] : memref<15x1x32xf32, #tpu.memory_space<vmem>>, vector<1x1x32xf32>
    %199 = vector.shape_cast %198 : vector<1x1x32xf32> to vector<1x32xf32>
    %200 = vector.broadcast %199 : vector<1x32xf32> to vector<2x32xf32>
    %201 = arith.addf %197, %200 : vector<2x32xf32>
    %202 = math.tanh %201 : vector<2x32xf32>
    %cst_120 = arith.constant dense<0.000000e+00> : vector<32xf32>
    %203 = vector.multi_reduction <add>, %202, %cst_120 [0] : vector<2x32xf32> to vector<32xf32>
    %204 = vector.shape_cast %203 : vector<32xf32> to vector<1x32xf32>
    %cst_121 = arith.constant 2.000000e+00 : f32
    %205 = vector.broadcast %cst_121 : f32 to vector<1x32xf32>
    %206 = arith.divf %204, %205 : vector<1x32xf32>
    %207 = vector.broadcast %206 : vector<1x32xf32> to vector<2x32xf32>
    %208 = arith.subf %202, %207 : vector<2x32xf32>
    %209 = arith.mulf %208, %208 : vector<2x32xf32>
    %cst_122 = arith.constant dense<0.000000e+00> : vector<32xf32>
    %210 = vector.multi_reduction <add>, %209, %cst_122 [0] : vector<2x32xf32> to vector<32xf32>
    %211 = vector.shape_cast %210 : vector<32xf32> to vector<1x32xf32>
    %cst_123 = arith.constant 2.000000e+00 : f32
    %212 = vector.broadcast %cst_123 : f32 to vector<1x32xf32>
    %213 = arith.divf %211, %212 : vector<1x32xf32>
    %214 = vector.broadcast %206 : vector<1x32xf32> to vector<2x32xf32>
    %215 = arith.subf %202, %214 : vector<2x32xf32>
    %cst_124 = arith.constant 9.99999974E-6 : f32
    %216 = vector.broadcast %cst_124 : f32 to vector<1x32xf32>
    %217 = arith.addf %213, %216 : vector<1x32xf32>
    %218 = math.rsqrt %217 : vector<1x32xf32>
    %219 = vector.broadcast %218 : vector<1x32xf32> to vector<2x32xf32>
    %220 = arith.mulf %215, %219 : vector<2x32xf32>
    %c7 = arith.constant 7 : index
    %c0_125 = arith.constant 0 : index
    %c0_126 = arith.constant 0 : index
    %221 = vector.load %arg9[%c7, %c0_125, %c0_126] : memref<15x1x32xf32, #tpu.memory_space<vmem>>, vector<1x1x32xf32>
    %222 = vector.shape_cast %221 : vector<1x1x32xf32> to vector<1x32xf32>
    %223 = vector.broadcast %222 : vector<1x32xf32> to vector<2x32xf32>
    %224 = arith.mulf %220, %223 : vector<2x32xf32>
    %c11 = arith.constant 11 : index
    %c0_127 = arith.constant 0 : index
    %c0_128 = arith.constant 0 : index
    %225 = vector.load %arg9[%c11, %c0_127, %c0_128] : memref<15x1x32xf32, #tpu.memory_space<vmem>>, vector<1x1x32xf32>
    %226 = vector.shape_cast %225 : vector<1x1x32xf32> to vector<1x32xf32>
    %227 = vector.broadcast %226 : vector<1x32xf32> to vector<2x32xf32>
    %228 = arith.addf %224, %227 : vector<2x32xf32>
    %c0_129 = arith.constant 0 : index
    %c0_130 = arith.constant 0 : index
    %229 = vector.load %arg13[%c0_129, %c0_130] : memref<33x2xf32, #tpu.memory_space<vmem>>, vector<32x2xf32>
    %cst_131 = arith.constant dense<0.000000e+00> : vector<2x2xf32>
    %230 = tpu.matmul %228, %229, %cst_131 {dimension_numbers = #tpu.dot_dimension_numbers<[1], [0], [0], [1], [0, 0, 1, 1], [], []>} : vector<2x32xf32>, vector<32x2xf32>, vector<2x2xf32> -> vector<2x2xf32>
    %c32 = arith.constant 32 : index
    %c0_132 = arith.constant 0 : index
    %231 = vector.load %arg13[%c32, %c0_132] : memref<33x2xf32, #tpu.memory_space<vmem>>, vector<1x2xf32>
    %232 = vector.broadcast %231 : vector<1x2xf32> to vector<2x2xf32>
    %233 = arith.addf %230, %232 : vector<2x2xf32>
    %c0_133 = arith.constant 0 : index
    %c0_134 = arith.constant 0 : index
    %234 = vector.load %arg14[%c0_133, %c0_134] : memref<2x2xf32, #tpu.memory_space<vmem>>, vector<2x2xf32>
    tpu.vector_store %arg14[%c0_133, %c0_134], %233 {strides = array<i32>} : memref<2x2xf32, #tpu.memory_space<vmem>>, vector<2x2xf32>,
    return
  }
  func.func @transform_0(%arg0: i32) -> (i32, i32) {
    %c0_i32 = arith.constant 0 : i32
    %c0_i32_0 = arith.constant 0 : i32
    %c0_i32_1 = arith.constant 0 : i32
    return %c0_i32, %c0_i32_0 : i32, i32
  }
  func.func @transform_1(%arg0: i32) -> (i32, i32) {
    %c0_i32 = arith.constant 0 : i32
    %c0_i32_0 = arith.constant 0 : i32
    %c0_i32_1 = arith.constant 0 : i32
    return %c0_i32, %c0_i32_0 : i32, i32
  }
  func.func @transform_2(%arg0: i32) -> (i32, i32) {
    %c0_i32 = arith.constant 0 : i32
    %c0_i32_0 = arith.constant 0 : i32
    %c0_i32_1 = arith.constant 0 : i32
    return %c0_i32, %c0_i32_0 : i32, i32
  }
  func.func @transform_3(%arg0: i32) -> (i32, i32) {
    %c0_i32 = arith.constant 0 : i32
    %c0_i32_0 = arith.constant 0 : i32
    %c0_i32_1 = arith.constant 0 : i32
    return %c0_i32, %c0_i32_0 : i32, i32
  }
  func.func @transform_4(%arg0: i32) -> (i32, i32) {
    %c0_i32 = arith.constant 0 : i32
    %c0_i32_0 = arith.constant 0 : i32
    %c0_i32_1 = arith.constant 0 : i32
    return %c0_i32, %c0_i32_0 : i32, i32
  }
  func.func @transform_5(%arg0: i32) -> (i32, i32) {
    %c0_i32 = arith.constant 0 : i32
    %c0_i32_0 = arith.constant 0 : i32
    %c0_i32_1 = arith.constant 0 : i32
    return %c0_i32, %c0_i32_0 : i32, i32
  }
  func.func @transform_6(%arg0: i32) -> (i32, i32, i32) {
    %c0_i32 = arith.constant 0 : i32
    %c0_i32_0 = arith.constant 0 : i32
    %c0_i32_1 = arith.constant 0 : i32
    %c0_i32_2 = arith.constant 0 : i32
    return %c0_i32, %c0_i32_0, %c0_i32_1 : i32, i32, i32
  }
  func.func @transform_7(%arg0: i32) -> (i32, i32, i32) {
    %c0_i32 = arith.constant 0 : i32
    %c0_i32_0 = arith.constant 0 : i32
    %c0_i32_1 = arith.constant 0 : i32
    %c0_i32_2 = arith.constant 0 : i32
    return %c0_i32, %c0_i32_0, %c0_i32_1 : i32, i32, i32
  }
  func.func @transform_8(%arg0: i32) -> (i32, i32, i32) {
    %c0_i32 = arith.constant 0 : i32
    %c0_i32_0 = arith.constant 0 : i32
    %c0_i32_1 = arith.constant 0 : i32
    %c0_i32_2 = arith.constant 0 : i32
    return %c0_i32, %c0_i32_0, %c0_i32_1 : i32, i32, i32
  }
  func.func @transform_9(%arg0: i32) -> (i32, i32) {
    %c0_i32 = arith.constant 0 : i32
    %c0_i32_0 = arith.constant 0 : i32
    %c0_i32_1 = arith.constant 0 : i32
    return %c0_i32, %c0_i32_0 : i32, i32
  }
  func.func @transform_10(%arg0: i32) -> (i32, i32, i32) {
    %c0_i32 = arith.constant 0 : i32
    %c0_i32_0 = arith.constant 0 : i32
    %c0_i32_1 = arith.constant 0 : i32
    %c0_i32_2 = arith.constant 0 : i32
    return %c0_i32, %c0_i32_0, %c0_i32_1 : i32, i32, i32
  }
  func.func @transform_11(%arg0: i32) -> (i32, i32) {
    %c0_i32 = arith.constant 0 : i32
    %c0_i32_0 = arith.constant 0 : i32
    %c0_i32_1 = arith.constant 0 : i32
    return %c0_i32, %c0_i32_0 : i32, i32
  }
  func.func @transform_12(%arg0: i32) -> (i32, i32) {
    %c0_i32 = arith.constant 0 : i32
    %c0_i32_0 = arith.constant 0 : i32
    %c0_i32_1 = arith.constant 0 : i32
    return %c0_i32, %c0_i32_0 : i32, i32
  }
  func.func @transform_13(%arg0: i32) -> (i32, i32) {
    %c0_i32 = arith.constant 0 : i32
    %c0_i32_0 = arith.constant 0 : i32
    %c0_i32_1 = arith.constant 0 : i32
    return %c0_i32, %c0_i32_0 : i32, i32
  }
}

</mosaic_0001>

<bundles_post_ra>
// kernel: tpu_custom_call.1
= control target key start
LH: loop header
LB: loop body
LE: loop exit
PB: predicated region body
PF: predicated region fallthrough
CT: control target
= control target key end

     0   :  { %18 = vsyncpa [#allocation3], 0  ;;  %s3928_s0 = inlined_call_operand.vmem [shape: f32[16,8], index: 0, kind: input, shape index: {}]   ;;  %s3929_s1 = inlined_call_operand.vmem [shape: f32[32,9], index: 1, kind: input, shape index: {}]   ;;  %s3930_s2 = inlined_call_operand.vmem [shape: s32[32,1], index: 2, kind: input, shape index: {}]   ;;  %s3931_s3 = inlined_call_operand.hbm [shape: s32[1,32], index: 3, kind: input, shape index: {}]   ;;  %s3932_s4 = inlined_call_operand.hbm [shape: s32[1,16], index: 4, kind: input, shape index: {}]   ;;  %s3933_s5 = inlined_call_operand.hbm [shape: f32[8,32], index: 5, kind: input, shape index: {}]   ;;  %s3934_s6 = inlined_call_operand.vmem [shape: f32[3,32,160], index: 6, kind: input, shape index: {}]   ;;  %s3935_s7 = inlined_call_operand.hbm [shape: f32[6,32,32], index: 7, kind: input, shape index: {}]   ;;  %s3936_s8 = inlined_call_operand.vmem [shape: f32[15,1,32], index: 8, kind: input, shape index: {}]   ;;  %s3937_s9 = inlined_call_operand.vmem [shape: f32[9,15], index: 9, kind: input, shape index: {}]   ;;  %s3938_s10 = inlined_call_operand.vmem [shape: f32[3,15,160], index: 10, kind: input, shape index: {}]   ;;  %s3939_s11 = inlined_call_operand.vmem [shape: f32[160,32], index: 11, kind: input, shape index: {}]   ;;  %s3940_s12 = inlined_call_operand.vmem [shape: f32[33,2], index: 12, kind: input, shape index: {}]   ;;  %s3941_s13 = inlined_call_operand.hbm [shape: f32[2,2], index: 13, kind: output, shape index: {}]  }
   0x1   :  { %19 = vsyncpa [#allocation6], 0 }
   0x2   :  { %20 = vsyncpa [#allocation9], 0 }
   0x3   :  { %21 = vsyncpa [#allocation4], 0  ;;  %s3172_s25 = smov [#allocation5]   ;;  %s3173_s27 = smov [#allocation2]  }
   0x4   :  { %s44_s26 = sshll.u32 %s3172_s25, 4  ;;  %s34_s28 = sshll.u32 %s3173_s27, 4  ;;  %s45_s26 = int_to_ptr.vmem [resolvable:$true] %s44_s26  ;;  %s35_s28 = int_to_ptr.vmem [resolvable:$true] %s34_s28 }
   0x5   :  { %s3072_s29 = scalar_lea.vmem %s45_s26, 16  ;;  %s3076_s30 = scalar_lea.vmem %s45_s26, 32 }
   0x6   :  { %p3073_p0 = scmp.ne.s32.totalorder %s45_s26, %s3072_s29  ;;  %p3077_p1 = scmp.lt.s32.totalorder %s45_s26, %s45_s26 }
   0x7   :  { %p3078_p2 = scmp.lt.s32.totalorder %s3076_s30, %s3072_s29 }
   0x9   :  { %p3079_p3 = por %p3078_p2, %p3077_p1 }
   0xb   :  { %p3080_p4 = pnand %p3079_p3, %p3073_p0 }
   0xd   :  { %3083 = shalt.err (!%p3080_p4)
}
   0xe   :  { %47 = dma.hbm_to_vmem [thread:$0]  %s3932_s4, 16, %s45_s26, [#allocation6]  }
   0xf   :  { %s3092_s16 = scalar_lea.vmem %s35_s28, 16  ;;  %s3096_s17 = scalar_lea.vmem %s35_s28, 32 }
  0x10   :  { %p3093_p5 = scmp.ne.s32.totalorder %s35_s28, %s3092_s16  ;;  %p3097_p6 = scmp.lt.s32.totalorder %s35_s28, %s35_s28 }
  0x11   :  { %p3098_p7 = scmp.lt.s32.totalorder %s3096_s17, %s3092_s16 }
  0x13   :  { %p3099_p8 = por %p3098_p7, %p3097_p6 }
  0x15   :  { %p3100_p9 = pnand %p3099_p8, %p3093_p5 }
  0x17   :  { %3103 = shalt.err (!%p3100_p9)
}
  0x18   :  { %37 = dma.hbm_to_vmem [thread:$0]  %s3931_s3, 16, %s35_s28, [#allocation3]  }
  0x19   :  { %s3174_s20 = smov [#allocation7]   ;;  %s3175_s22 = smov [#allocation8]  }
  0x1a   :  { %s54_s21 = sshll.u32 %s3174_s20, 4  ;;  %s65_s23 = sshll.u32 %s3175_s22, 4  ;;  %s55_s21 = int_to_ptr.vmem [resolvable:$true] %s54_s21  ;;  %s66_s23 = int_to_ptr.vmem [resolvable:$true] %s65_s23 }
  0x1b   :  { %s3112_s24 = scalar_lea.vmem %s55_s21, 128  ;;  %p3117_p11 = scmp.lt.s32.totalorder %s55_s21, %s55_s21 }
  0x1c   :  { %p3113_p10 = scmp.ne.s32.totalorder %s55_s21, %s3112_s24  ;;  %p3118_p12 = scmp.lt.s32.totalorder %s3112_s24, %s3112_s24 }
  0x1e   :  { %p3119_p13 = por %p3118_p12, %p3117_p11 }
  0x20   :  { %p3120_p0 = pnand %p3119_p13, %p3113_p10 }
  0x22   :  { %3123 = shalt.err (!%p3120_p0)
}
  0x23   :  { %57 = dma.hbm_to_vmem [thread:$0]  %s3933_s5, 128, %s55_s21, [#allocation6]  }
  0x24   :  { %s3132_s26 = scalar_lea.vmem %s66_s23, 3072  ;;  %p3137_p2 = scmp.lt.s32.totalorder %s66_s23, %s66_s23 }
  0x25   :  { %p3133_p1 = scmp.ne.s32.totalorder %s66_s23, %s3132_s26  ;;  %p3138_p3 = scmp.lt.s32.totalorder %s3132_s26, %s3132_s26 }
  0x27   :  { %p3139_p4 = por %p3138_p3, %p3137_p2 }
  0x29   :  { %p3140_p5 = pnand %p3139_p4, %p3133_p1 }
  0x2b   :  { %3143 = shalt.err (!%p3140_p5)
}
  0x2c   :  { %s3176_s3 = smov 128   ;;  %s3177_s27 = smov 8  }
  0x2d   :  { %71 = dma.hbm_to_vmem [thread:$0]  %s3935_s7, 3072, %s66_s23, [#allocation9], %s3176_s3, %s3176_s3, %s3177_s27  }
  0x2e   :  { %3164 = dma.done.wait [#allocation3], 16  }
  0x2f   :  { %3165 = vsyncadd [#allocation3], 4294967280 }
  0x30   :  { %3166 = dma.done.wait [#allocation6], 144  }
  0x31   :  { %3167 = vsyncadd [#allocation6], 4294967152 }
  0x32   :  { %3168 = dma.done.wait [#allocation9], 3072  }
  0x33   :  { %3169 = vsyncadd [#allocation9], 4294964224  ;;  %vm309_vm0 = vcmask 64512   ;;  %vm178_vm1 = vcmask 1040384   ;;  %v301_v0 = vld [vmem:[#allocation7] sm:$0xff]  ;;  %vm165_vm2 = vcmask 72704   ;;  %v94_v48 = vlaneseq }
  0x34   :  { %v299_v1 = vld [vmem:[%s3928_s0] sm:$0xff]  ;;  %v300_v2 = vld [vmem:[%s3928_s0 + $0x8] sm:$0xff]  ;;  %2896 = vmatprep.subr.mxu1 %v301_v0  ;;  %v398_v7 = vld [vmem:[%s3934_s6 + $0x38] sm:$0xff]  ;;  %v3178_v17 = vmov 0.0   ;;  %v3179_v20 = vmov 0   ;;  %vm601_vm3 = vcmask 1046528  }
  0x35   :  { %2898 = vmatprep.mubr.msk.f32.mxu1 %vm309_vm0, %v299_v1  ;;  %v164_v3 = vld [vmem:[%s3937_s9 + $0x8] sm:$0x1]  ;;  %v163_v4 = vld [vmem:[%s3937_s9] sm:$0xff]  ;;  %2897 = vmatpush3.msra.mxu1 %v301_v0  ;;  %v397_v8 = vld [vmem:[%s3934_s6 + $0x30] sm:$0xff]  ;;  %vm146_vm4 = vcmask 261120   ;;  %vm588_vm5 = vcmask 121856  }
  0x36   :  { %v159_v5 = vld [vmem:[%s3929_s1] sm:$0xff]  ;;  %2886 = vmatprep.subr.msk.mxu0 %vm178_vm1, %v164_v3  ;;  %2899 = vmatmul.mubr.msk.f32.vlgmr.msra.gmra.mxu1 %vm309_vm0, %v300_v2  ;;  %v160_v6 = vld [vmem:[%s3929_s1 + $0x8] sm:$0xff]  ;;  %v161_v9 = vld [vmem:[%s3929_s1 + $0x10] sm:$0xff]  ;;  %v95_v50 = vand.u32 127, %v94_v48  ;;  %vm482_vm7 = vcmask 130048   ;;  %vm3180_vm13 = vmmov 0  }
  0x37   :  { %2887 = vmatpush3.msk.msra.mxu0 %vm178_vm1, %v164_v3  ;;  %2890 = vmatprep.mubr.msk.f32.mxu0 %vm165_vm2, %v159_v5  ;;  %v396_v10 = vld [vmem:[%s3934_s6 + $0x28] sm:$0xff]  ;;  %v162_v11 = vld [vmem:[%s3929_s1 + $0x18] sm:$0xff]  ;;  %v395_v12 = vld [vmem:[%s3934_s6 + $0x20] sm:$0xff]  ;;  %vm2163_vm15 = vcmask 254976   ;;  %s3181_s3 = smov [#allocation10]   ;;  %vm2664_vm0 = vcmask 9216  }
  0x38   :  { %2888 = vmatprep.subr.mxu0 %v163_v4  ;;  %429 = vmatprep.subr.mxu1 %v398_v7  ;;  %v394_v13 = vld [vmem:[%s3934_s6 + $0x18] sm:$0xff]  ;;  %v393_v14 = vld [vmem:[%s3934_s6 + $0x10] sm:$0xff]  ;;  %v392_v15 = vld [vmem:[%s3934_s6 + $0x8] sm:$0xff] }
  0x39   :  { %2889 = vmatpush3.msra.mxu0 %v163_v4  ;;  %430 = vmatpush1.msra.mxu1 %v397_v8  ;;  %v391_v16 = vld [vmem:[%s3934_s6] sm:$0xff]  ;;  %v98_v19 = vld [vmem:[%s3930_s2 + $0x10] sm:$0xff]  ;;  %v97_v21 = vld [vmem:[%s3930_s2 + $0x8] sm:$0xff] }
  0x3a   :  { %2891 = vmatmul.mubr.msk.f32.vlgmr.msra.gmra.mxu0 %vm165_vm2, %v160_v6  ;;  %431 = vmatprep.subr.mxu1 %v396_v10  ;;  %v96_v18 = vld [vmem:[%s3930_s2] sm:$0xff]  ;;  %v99_v22 = vld [vmem:[%s3930_s2 + $0x18] sm:$0xff]  ;;  %v586_v41 = vld [vmem:[%s3938_s10 + $0x10] sm:$0x7f]  ;;  %s2672_s2 = sshll.u32 %s3181_s3, 4  ;;  %s2673_s2 = int_to_ptr.vmem [resolvable:$true] %s2672_s2 }
  0x3b   :  { %2893 = vmatprep.mubr.msk.f32.mxu0 %vm165_vm2, %v161_v9  ;;  %432 = vmatpush1.msra.mxu1 %v395_v12  ;;  %v587_v23 = vld [vmem:[%s3938_s10 + $0x18] sm:$0x7f]  ;;  %v2697_v25 = vld [vmem:[%s3936_s8] ss:$0 sm:$0xff]  ;;  %v585_v43 = vld [vmem:[%s3938_s10 + $0x8] sm:$0xff]  ;;  %s3144_s27 = scalar_lea.vmem %s2673_s2, 32  ;;  %p3149_p7 = scmp.lt.s32.totalorder %s2673_s2, %s2673_s2 }
  0x3c   :  { %433 = vmatprep.subr.mxu1 %v394_v13  ;;  %469 = vmatprep.mubr.f32.mxu1 %v3178_v17  ;;  %v584_v44 = vld [vmem:[%s3938_s10] sm:$0xff]  ;;  %v3383_v57 = vld [vmem:[%s3939_s11 + $0x78] sm:$0xff]  ;;  %v3391_v59 = vld [vmem:[%s3939_s11 + $0x70] sm:$0xff]  ;;  %p3145_p6 = scmp.ne.s32.totalorder %s2673_s2, %s3144_s27  ;;  %p3150_p8 = scmp.lt.s32.totalorder %s3144_s27, %s3144_s27 }
  0x3d   :  { %434 = vmatpush1.msra.mxu1 %v393_v14  ;;  %3028 = vset.pattern.permute.xlu0 %v3179_v20  ;;  %v3399_v60 = vld [vmem:[%s3939_s11 + $0x68] sm:$0xff]  ;;  %v3411_v62 = vld [vmem:[%s3939_s11 + $0x60] sm:$0xff]  ;;  %v3422_v1 = vld [vmem:[%s3939_s11 + $0x58] sm:$0xff] }
  0x3e   :  { %2894 = vmatmul.mubr.msk.f32.gmra.mxu0 %vm165_vm2, %v162_v11  ;;  %435 = vmatprep.subr.mxu1 %v392_v15  ;;  %v3431_v2 = vld [vmem:[%s3939_s11 + $0x50] sm:$0xff]  ;;  %v3439_v3 = vld [vmem:[%s3939_s11 + $0x48] sm:$0xff]  ;;  %v3451_v5 = vld [vmem:[%s3939_s11 + $0x40] sm:$0xff]  ;;  %p3151_p9 = por %p3150_p8, %p3149_p7 }
  0x3f   :  { %436 = vmatpush1.msra.mxu1 %v391_v16  ;;  %559 = vmatprep.mubr.f32.mxu0 %v3178_v17  ;;  %v3458_v6 = vld [vmem:[%s3939_s11 + $0x38] sm:$0xff]  ;;  %v3465_v7 = vld [vmem:[%s3939_s11 + $0x30] sm:$0xff]  ;;  %v3472_v8 = vld [vmem:[%s3939_s11 + $0x28] sm:$0xff] }
  0x40   :  { %3029 = vset.pattern.permute.xlu1 %v3179_v20  ;;  %101 = vperm.xlu0 %3028, %v96_v18   ;;  %v3479_v9 = vld [vmem:[%s3939_s11 + $0x20] sm:$0xff]  ;;  %v3486_v10 = vld [vmem:[%s3939_s11 + $0x18] sm:$0xff]  ;;  %v3493_v11 = vld [vmem:[%s3939_s11 + $0x10] sm:$0xff]  ;;  %p3152_p10 = pnand %p3151_p9, %p3145_p6 }
  0x41   :  { %107 = vperm.xlu1 %3029, %v98_v19   ;;  %2706 = vmatprep.subr.msk.mxu1 %vm601_vm3, %v587_v23  ;;  %v3500_v12 = vld [vmem:[%s3939_s11 + $0x8] sm:$0xff]  ;;  %v3507_v13 = vld [vmem:[%s3939_s11] sm:$0xff]  ;;  %v3514_v14 = vld [vmem:[%s3939_s11 + $0x98] sm:$0xff] }
  0x42   :  { %v3523_v15 = vld [vmem:[%s3939_s11 + $0x90] sm:$0xff]  ;;  %v3530_v16 = vld [vmem:[%s3939_s11 + $0x88] sm:$0xff]  ;;  %v3537_v18 = vld [vmem:[%s3939_s11 + $0x80] sm:$0xff] }
  0x43   :  { %v2739_v19 = vld [vmem:[%s3938_s10 + $0x38] sm:$0x7f] }
  0x44   :  { %104 = vperm.xlu0 %3028, %v97_v21  }
  0x45   :  { %110 = vperm.xlu1 %3029, %v99_v22  }
  0xbb   :  { %v102_v52 = vpop.permute.xlu0 %101 }
  0xbc   :  { %vm112_vm6 = vcmp.eq.s32.totalorder %v102_v52, %v95_v50  ;;  %v108_v58 = vpop.permute.xlu1 %107 }
  0xbd   :  { %v3378_v55 = vsel %vm112_vm6, 1.0, %v3178_v17  ;;  %vm114_vm9 = vcmp.eq.s32.totalorder %v108_v58, %v95_v50 }
  0xbe   :  { %v3414_v63 = vsel %vm114_vm9, 1.0, %v3178_v17 }
  0xbf   :  { %v105_v56 = vpop.permute.xlu0 %104 }
  0xc0   :  { %vm113_vm8 = vcmp.eq.s32.totalorder %v105_v56, %v95_v50  ;;  %v111_v0 = vpop.permute.xlu1 %110  ;;  %v2687_v56 = vld [vmem:[#allocation2] ss:$0 sm:$0xff] }
  0xc1   :  { %v3402_v61 = vsel %vm113_vm8, 1.0, %v3178_v17  ;;  %vm115_vm10 = vcmp.eq.s32.totalorder %v111_v0, %v95_v50 }
  0xc2   :  { %v3442_v4 = vsel %vm115_vm10, 1.0, %v3178_v17 }
  0xf6   :  { %v2900_v24 = vpop.f32.mrf.mxu1 }
  0xf7   :  { %v3342_v28 = vadd.f32 %v2900_v24, %v2697_v25 }
  0xf8   :  { %v382_v26 = vpop.f32.mrf.mxu1 }
  0xf9   :  { %v3337_v27 = vadd.f32 %v2697_v25, %v382_v26 }
  0xfa   :  { %v2892_v29 = vpop.f32.mrf.mxu0 }
  0xfb   :  { %2700 = vmatmul.mubr.msk.f32.vlgmr.msra.gmra.mxu1 %vm146_vm4, %v3337_v27  ;;  %v268_v33 = vsub.f32 0.0, %v2892_v29 }
  0xfc   :  { %475 = vmatprep.mubr.f32.mxu1 %v3178_v17  ;;  %v248_v30 = vpop.f32.mrf.mxu0  ;;  %2707 = vmatpush1.msk.msra.mxu1 %vm601_vm3, %v586_v41 }
  0xfd   :  { %v267_v31 = vsub.f32 0.0, %v248_v30  ;;  %v273_v36 = vmul.f32 1.442695, %v268_v33  ;;  %638 = vmatprep.subr.mxu1 %v585_v43  ;;  %v2737_v33 = vld [vmem:[%s3938_s10 + $0x28] sm:$0xff] }
  0xfe   :  { %v2895_v32 = vpop.f32.mrf.mxu0  ;;  %639 = vmatpush1.msra.mxu1 %v584_v44 }
  0xff   :  { %2701 = vmatmul.mubr.msk.f32.gmra.mxu1 %vm146_vm4, %v3342_v28  ;;  %v271_v34 = vmul.f32 1.442695, %v267_v31  ;;  %v270_v38 = vsub.f32 0.0, %v2895_v32  ;;  %v2738_v32 = vld [vmem:[%s3938_s10 + $0x30] sm:$0x7f] }
 0x100   :  { %672 = vmatprep.mubr.f32.mxu1 %v3178_v17  ;;  %v258_v35 = vpop.f32.mrf.mxu0 }
 0x101   :  { %3030 = vpow2.f32 %v271_v34  ;;  %v269_v37 = vsub.f32 0.0, %v258_v35  ;;  %v277_v40 = vmul.f32 1.442695, %v270_v38 }
 0x102   :  { %3032 = vpow2.f32 %v273_v36  ;;  %v2736_v36 = vld [vmem:[%s3938_s10 + $0x20] sm:$0xff] }
 0x103   :  { %v275_v39 = vmul.f32 1.442695, %v269_v37 }
 0x105   :  { %3034 = vpow2.f32 %v275_v39 }
 0x106   :  { %3036 = vpow2.f32 %v277_v40 }
 0x10e   :  { %v3350_v42 = vpop.eup %3030 }
 0x10f   :  { %2708 = vmatmul.mubr.msk.f32.vlgmr.msra.gmra.mxu1 %vm588_vm5, %v3350_v42  ;;  %v3361_v45 = vpop.eup %3032 }
 0x110   :  { %678 = vmatprep.mubr.f32.mxu1 %v3178_v17 }
 0x112   :  { %v3366_v46 = vpop.eup %3034 }
 0x113   :  { %2709 = vmatmul.mubr.msk.f32.gmra.mxu1 %vm588_vm5, %v3361_v45  ;;  %v3371_v47 = vpop.eup %3036 }
 0x114   :  { %684 = vmatprep.mubr.f32.mxu1 %v3178_v17 }
 0x117   :  { %2710 = vmatmul.mubr.msk.f32.gmra.mxu1 %vm588_vm5, %v3366_v46 }
 0x118   :  { %690 = vmatprep.mubr.f32.mxu1 %v3178_v17 }
 0x11b   :  { %2711 = vmatmul.mubr.msk.f32.gmra.mxu1 %vm588_vm5, %v3371_v47 }
 0x1bb   :  { %v471_v49 = vpop.f32.mrf.mxu1 }
 0x1bd   :  { %v473_v51 = vpop.f32.mrf.mxu1 }
 0x1bf   :  { %v477_v53 = vpop.f32.mrf.mxu1 }
 0x1c1   :  { %v479_v54 = vpop.f32.mrf.mxu1 }
 0x1c2   :  { %523 = vmatprep.subr.mxu0 %v479_v54  ;;  %v3571_v54 = vshrl.u32 %v94_v48, 7 }
 0x1c3   :  { %524 = vmatpush1.msra.mxu0 %v477_v53 }
 0x1c4   :  { %525 = vmatprep.subr.mxu0 %v473_v51  ;;  %vm132_vm11 = vcmp.eq.s32.totalorder %v3571_v54, %v2687_v56  ;;  %v126_v0 = vadd.s32 8, %v3571_v54 }
 0x1c5   :  { %526 = vmatpush1.msra.mxu0 %v471_v49  ;;  %v3575_v58 = vsel %vm132_vm11, 1.0, %v3178_v17 }
 0x1c6   :  { %2702 = vmatmul.mubr.msk.f32.vlgmr.msra.gmra.mxu0 %vm482_vm7, %v3378_v55  ;;  %717 = vmatprep.subr.mxu0 %v3178_v17  ;;  %vm133_vm12 = vcmp.eq.s32.totalorder %v126_v0, %v2687_v56 }
 0x1c7   :  { %565 = vmatprep.mubr.f32.mxu0 %v3178_v17  ;;  %718 = vmatpush1.msra.mxu0 %v3383_v57 }
 0x1c8   :  { %719 = vmatprep.subr.mxu0 %v3178_v17  ;;  %2909 = vmatprep.mubr.msk.f32.mxu1 %vm146_vm4, %v3575_v58 }
 0x1c9   :  { %720 = vmatpush1.msra.mxu0 %v3391_v59 }
 0x1ca   :  { %2703 = vmatmul.mubr.msk.f32.gmra.mxu0 %vm482_vm7, %v3402_v61  ;;  %721 = vmatprep.subr.mxu0 %v3178_v17 }
 0x1cb   :  { %571 = vmatprep.mubr.f32.mxu0 %v3178_v17  ;;  %722 = vmatpush1.msra.mxu0 %v3399_v60 }
 0x1cc   :  { %723 = vmatprep.subr.mxu0 %v3178_v17 }
 0x1cd   :  { %724 = vmatpush1.msra.mxu0 %v3411_v62 }
 0x1ce   :  { %2704 = vmatmul.mubr.msk.f32.gmra.mxu0 %vm482_vm7, %v3414_v63  ;;  %725 = vmatprep.subr.mxu0 %v3178_v17 }
 0x1cf   :  { %577 = vmatprep.mubr.f32.mxu0 %v3178_v17  ;;  %726 = vmatpush1.msra.mxu0 %v3422_v1  ;;  %v674_v20 = vpop.f32.mrf.mxu1 }
 0x1d0   :  { %727 = vmatprep.subr.mxu0 %v3178_v17 }
 0x1d1   :  { %728 = vmatpush1.msra.mxu0 %v3431_v2  ;;  %v676_v21 = vpop.f32.mrf.mxu1 }
 0x1d2   :  { %2705 = vmatmul.mubr.msk.f32.gmra.mxu0 %vm482_vm7, %v3442_v4  ;;  %729 = vmatprep.subr.mxu0 %v3178_v17 }
 0x1d3   :  { %730 = vmatpush1.msra.mxu0 %v3439_v3  ;;  %v680_v22 = vpop.f32.mrf.mxu1 }
 0x1d4   :  { %731 = vmatprep.subr.mxu0 %v3178_v17 }
 0x1d5   :  { %732 = vmatpush1.msra.mxu0 %v3451_v5  ;;  %v682_v23 = vpop.f32.mrf.mxu1 }
 0x1d6   :  { %733 = vmatprep.subr.mxu0 %v3178_v17 }
 0x1d7   :  { %734 = vmatpush1.msra.mxu0 %v3458_v6  ;;  %v686_v25 = vpop.f32.mrf.mxu1 }
 0x1d8   :  { %735 = vmatprep.subr.mxu0 %v3178_v17 }
 0x1d9   :  { %736 = vmatpush1.msra.mxu0 %v3465_v7  ;;  %v688_v34 = vpop.f32.mrf.mxu1 }
 0x1da   :  { %737 = vmatprep.subr.mxu0 %v3178_v17 }
 0x1db   :  { %738 = vmatpush1.msra.mxu0 %v3472_v8  ;;  %v692_v40 = vpop.f32.mrf.mxu1 }
 0x1dc   :  { %739 = vmatprep.subr.mxu0 %v3178_v17 }
 0x1dd   :  { %740 = vmatpush1.msra.mxu0 %v3479_v9  ;;  %v694_v50 = vpop.f32.mrf.mxu1 }
 0x1de   :  { %741 = vmatprep.subr.mxu0 %v3178_v17 }
 0x1df   :  { %742 = vmatpush1.msra.mxu0 %v3486_v10 }
 0x1e0   :  { %743 = vmatprep.subr.mxu0 %v3178_v17 }
 0x1e1   :  { %744 = vmatpush1.msra.mxu0 %v3493_v11 }
 0x1e2   :  { %745 = vmatprep.subr.mxu0 %v3178_v17 }
 0x1e3   :  { %746 = vmatpush1.msra.mxu0 %v3500_v12 }
 0x1e4   :  { %747 = vmatprep.subr.mxu0 %v3178_v17 }
 0x1e5   :  { %748 = vmatpush1.msra.mxu0 %v3507_v13 }
 0x1e6   :  { %773 = vmatprep.subr.mxu0 %v3178_v17 }
 0x1e7   :  { %774 = vmatpush2.msra.mxu0 %v3514_v14 }
 0x1e8   :  { %775 = vmatprep.subr.mxu0 %v3178_v17 }
 0x1e9   :  { %776 = vmatpush2.msra.mxu0 %v3523_v15 }
 0x1ea   :  { %777 = vmatprep.subr.mxu0 %v3178_v17 }
 0x1eb   :  { %778 = vmatpush2.msra.mxu0 %v3530_v16 }
 0x1ec   :  { %779 = vmatprep.subr.mxu0 %v3178_v17 }
 0x1ed   :  { %780 = vmatpush2.msra.mxu0 %v3537_v18 }
 0x1ee   :  { %2740 = vmatprep.subr.msk.mxu0 %vm601_vm3, %v2739_v19  ;;  %v3583_v19 = vsel %vm133_vm12, 1.0, %v3178_v17 }
 0x1ef   :  { %v150_v48 = vsel %vm146_vm4, %v3583_v19, 0.0 }
 0x1f0   :  { %151 = vadd.xlane.f32.xlu1 %v150_v48 }
 0x286   :  { %v561_v24 = vpop.f32.mrf.mxu0 }
 0x287   :  { %v697_v30 = vmul.f32 %v674_v20, %v561_v24  ;;  %v147_v20 = vsel %vm146_vm4, %v3575_v58, 0.0 }
 0x288   :  { %v563_v26 = vpop.f32.mrf.mxu0  ;;  %148 = vadd.xlane.f32.xlu0 %v147_v20 }
 0x289   :  { %v698_v29 = vmul.f32 %v676_v21, %v563_v26 }
 0x28a   :  { %v567_v31 = vpop.f32.mrf.mxu0 }
 0x28b   :  { %2712 = vmatprep.mubr.msk.f32.mxu0 %vm146_vm4, %v698_v29  ;;  %v699_v38 = vmul.f32 %v680_v22, %v567_v31  ;;  %v888_v31 = vld [vmem:[#allocation8 + $0x18] sm:$0xff] }
 0x28c   :  { %v569_v35 = vpop.f32.mrf.mxu0  ;;  %782 = vmatmul.mubr.f32.vlgmr.msra.gmra.mxu0 %v697_v30 }
 0x28d   :  { %v700_v37 = vmul.f32 %v682_v23, %v569_v35  ;;  %2741 = vmatpush1.msk.msra.mxu0 %vm601_vm3, %v2738_v32  ;;  %v887_v32 = vld [vmem:[#allocation8 + $0x10] sm:$0xff] }
 0x28e   :  { %v573_v39 = vpop.f32.mrf.mxu0  ;;  %1200 = vmatprep.subr.mxu0 %v2737_v33  ;;  %v886_v33 = vld [vmem:[#allocation8 + $0x8] sm:$0xff] }
 0x28f   :  { %2713 = vmatprep.mubr.msk.f32.mxu0 %vm146_vm4, %v700_v37  ;;  %1201 = vmatpush1.msra.mxu0 %v2736_v36  ;;  %v701_v44 = vmul.f32 %v686_v25, %v573_v39  ;;  %v2729_v35 = vld [vmem:[%s3934_s6 + $0x78] sm:$0xff]  ;;  %v2727_v36 = vld [vmem:[%s3934_s6 + $0x68] sm:$0xff]  ;;  %v2726_v37 = vld [vmem:[%s3934_s6 + $0x60] sm:$0xff] }
 0x290   :  { %v575_v41 = vpop.f32.mrf.mxu0  ;;  %787 = vmatmul.mubr.f32.gmra.mxu0 %v699_v38  ;;  %v2724_v38 = vld [vmem:[%s3934_s6 + $0x50] sm:$0xff]  ;;  %v2723_v39 = vld [vmem:[%s3934_s6 + $0x48] sm:$0xff] }
 0x291   :  { %v702_v43 = vmul.f32 %v688_v34, %v575_v41  ;;  %v885_v34 = vld [vmem:[#allocation8] sm:$0xff]  ;;  %v152_v41 = vpop.xlane.xlu1 %151 }
 0x292   :  { %v579_v49 = vpop.f32.mrf.mxu0 }
 0x293   :  { %2714 = vmatprep.mubr.msk.f32.mxu0 %vm146_vm4, %v702_v43  ;;  %v703_v53 = vmul.f32 %v692_v40, %v579_v49  ;;  %v2722_v40 = vld [vmem:[%s3934_s6 + $0x40] sm:$0xff] }
 0x294   :  { %v581_v51 = vpop.f32.mrf.mxu0  ;;  %792 = vmatmul.mubr.f32.gmra.mxu0 %v701_v44  ;;  %v154_v44 = vmax.f32 %v152_v41, 1.0 }
 0x295   :  { %v704_v52 = vmul.f32 %v694_v50, %v581_v51 }
 0x296   :  { %3038 = vrcp.f32 %v154_v44  ;;  %v2772_v44 = vld [vmem:[%s3938_s10 + $0x50] sm:$0x7f] }
 0x297   :  { %2715 = vmatprep.mubr.msk.f32.mxu0 %vm146_vm4, %v704_v52 }
 0x298   :  { %797 = vmatmul.mubr.f32.gmra.mxu0 %v703_v53 }
 0x299   :  { %1234 = vmatprep.mubr.f32.mxu0 %v3178_v17 }
 0x29c   :  { %2742 = vmatmul.mubr.msk.f32.vlgmr.msra.gmra.mxu0 %vm588_vm5, %v3350_v42 }
 0x29d   :  { %1240 = vmatprep.mubr.f32.mxu0 %v3178_v17 }
 0x2a0   :  { %2743 = vmatmul.mubr.msk.f32.gmra.mxu0 %vm588_vm5, %v3361_v45 }
 0x2a1   :  { %1246 = vmatprep.mubr.f32.mxu0 %v3178_v17 }
 0x2a3   :  { %v3620_v51 = vpop.eup %3038 }
 0x2a4   :  { %2744 = vmatmul.mubr.msk.f32.gmra.mxu0 %vm588_vm5, %v3366_v46 }
 0x2a5   :  { %1252 = vmatprep.mubr.f32.mxu0 %v3178_v17 }
 0x2a8   :  { %2745 = vmatmul.mubr.msk.f32.gmra.mxu0 %vm588_vm5, %v3371_v47 }
 0x2a9   :  { %2931 = vmatprep.mubr.msk.f32.mxu0 %vm146_vm4, %v3575_v58 }
 0x311   :  { %v149_v43 = vpop.xlane.xlu0 %148 }
 0x312   :  { %v153_v49 = vmax.f32 %v149_v43, 1.0 }
 0x314   :  { %3040 = vrcp.f32 %v153_v49  ;;  %v2771_v49 = vld [vmem:[%s3938_s10 + $0x48] sm:$0xff] }
 0x321   :  { %v3622_v52 = vpop.eup %3040 }
 0x34c   :  { %v783_v21 = vpop.f32.mrf.mxu0 }
 0x34e   :  { %v785_v22 = vpop.f32.mrf.mxu0 }
 0x350   :  { %v788_v23 = vpop.f32.mrf.mxu0 }
 0x352   :  { %v790_v24 = vpop.f32.mrf.mxu0 }
 0x354   :  { %v793_v25 = vpop.f32.mrf.mxu0 }
 0x356   :  { %v795_v26 = vpop.f32.mrf.mxu0 }
 0x358   :  { %v798_v29 = vpop.f32.mrf.mxu0 }
 0x359   :  { %2901 = vmatprep.subr.mxu1 %v798_v29 }
 0x35a   :  { %v800_v30 = vpop.f32.mrf.mxu0  ;;  %2902 = vmatpush3.msra.mxu1 %v798_v29 }
 0x35b   :  { %2903 = vmatprep.subr.mxu1 %v793_v25 }
 0x35c   :  { %2904 = vmatpush3.msra.mxu1 %v793_v25 }
 0x35d   :  { %2905 = vmatprep.subr.mxu1 %v788_v23 }
 0x35e   :  { %2906 = vmatpush3.msra.mxu1 %v788_v23  ;;  %v2721_v23 = vld [vmem:[%s3936_s8 + $0x1] ss:$0 sm:$0xff] }
 0x35f   :  { %2907 = vmatprep.subr.mxu1 %v783_v21 }
 0x360   :  { %2908 = vmatpush3.msra.mxu1 %v783_v21 }
 0x361   :  { %2910 = vmatmul.mubr.msk.f32.vlgmr.msra.gmra.mxu1 %vm146_vm4, %v3583_v19  ;;  %2912 = vmatprep.subr.mxu1 %v888_v31 }
 0x362   :  { %2913 = vmatpush3.msra.mxu1 %v888_v31  ;;  %2920 = vmatprep.mubr.msk.f32.mxu1 %vm146_vm4, %v3337_v27  ;;  %v2728_v27 = vld [vmem:[%s3934_s6 + $0x70] sm:$0xff] }
 0x363   :  { %2914 = vmatprep.subr.mxu1 %v887_v32 }
 0x364   :  { %2915 = vmatpush3.msra.mxu1 %v887_v32 }
 0x365   :  { %2916 = vmatprep.subr.mxu1 %v886_v33 }
 0x366   :  { %2917 = vmatpush3.msra.mxu1 %v886_v33 }
 0x367   :  { %2918 = vmatprep.subr.mxu1 %v885_v34 }
 0x368   :  { %2919 = vmatpush3.msra.mxu1 %v885_v34  ;;  %v2773_v34 = vld [vmem:[%s3938_s10 + $0x58] sm:$0x7f] }
 0x369   :  { %2921 = vmatmul.mubr.msk.f32.vlgmr.msra.gmra.mxu1 %vm146_vm4, %v3342_v28  ;;  %1017 = vmatprep.subr.mxu1 %v2729_v35  ;;  %v2725_v28 = vld [vmem:[%s3934_s6 + $0x58] sm:$0xff]  ;;  %v1236_v35 = vpop.f32.mrf.mxu0 }
 0x36a   :  { %1057 = vmatprep.mubr.f32.mxu1 %v3178_v17  ;;  %1018 = vmatpush1.msra.mxu1 %v2728_v27 }
 0x36b   :  { %1019 = vmatprep.subr.mxu1 %v2727_v36  ;;  %v1238_v27 = vpop.f32.mrf.mxu0 }
 0x36c   :  { %1020 = vmatpush1.msra.mxu1 %v2726_v37 }
 0x36d   :  { %1021 = vmatprep.subr.mxu1 %v2725_v28  ;;  %v1242_v36 = vpop.f32.mrf.mxu0 }
 0x36e   :  { %1022 = vmatpush1.msra.mxu1 %v2724_v38 }
 0x36f   :  { %1023 = vmatprep.subr.mxu1 %v2723_v39  ;;  %v1244_v37 = vpop.f32.mrf.mxu0 }
 0x370   :  { %1024 = vmatpush1.msra.mxu1 %v2722_v40 }
 0x371   :  { %v1248_v38 = vpop.f32.mrf.mxu0 }
 0x421   :  { %v2911_v50 = vpop.f32.mrf.mxu1 }
 0x422   :  { %v884_v0 = vmul.f32 %v3620_v51, %v2911_v50  ;;  %v1250_v50 = vpop.f32.mrf.mxu0 }
 0x423   :  { %v874_v53 = vpop.f32.mrf.mxu1 }
 0x424   :  { %v883_v48 = vmul.f32 %v3622_v52, %v874_v53 }
 0x429   :  { %v2922_v56 = vpop.f32.mrf.mxu1 }
 0x42a   :  { %v965_v21 = vadd.f32 %v2922_v56, %v884_v0  ;;  %v2770_v56 = vld [vmem:[%s3938_s10 + $0x40] sm:$0xff] }
 0x42b   :  { %v955_v20 = vpop.f32.mrf.mxu1 }
 0x42c   :  { %v964_v22 = vadd.f32 %v955_v20, %v883_v48  ;;  %v975_v25 = vadd.f32 %v2721_v23, %v965_v21  ;;  %v1254_v21 = vpop.f32.mrf.mxu0 }
 0x42e   :  { %v974_v24 = vadd.f32 %v2721_v23, %v964_v22 }
 0x430   :  { %3042 = vtanh.f32 %v974_v24 }
 0x431   :  { %3044 = vtanh.f32 %v975_v25 }
 0x43d   :  { %v3629_v26 = vpop.eup %3042 }
 0x43e   :  { %2730 = vmatmul.mubr.msk.f32.vlgmr.msra.gmra.mxu1 %vm146_vm4, %v3629_v26  ;;  %v3634_v29 = vpop.eup %3044 }
 0x43f   :  { %1063 = vmatprep.mubr.f32.mxu1 %v3178_v17 }
 0x442   :  { %2731 = vmatmul.mubr.msk.f32.gmra.mxu1 %vm146_vm4, %v3634_v29 }
 0x443   :  { %1134 = vmatprep.mubr.f32.mxu1 %v3178_v17 }
 0x4fe   :  { %v1059_v30 = vpop.f32.mrf.mxu1 }
 0x500   :  { %v1061_v31 = vpop.f32.mrf.mxu1 }
 0x502   :  { %v1065_v32 = vpop.f32.mrf.mxu1 }
 0x504   :  { %v1067_v33 = vpop.f32.mrf.mxu1 }
 0x505   :  { %1098 = vmatprep.subr.mxu1 %v1067_v33 }
 0x506   :  { %1099 = vmatpush1.msra.mxu1 %v1065_v32 }
 0x507   :  { %1100 = vmatprep.subr.mxu1 %v1061_v31 }
 0x508   :  { %1101 = vmatpush1.msra.mxu1 %v1059_v30  ;;  %v1256_v30 = vpop.f32.mrf.mxu0 }
 0x509   :  { %2732 = vmatmul.mubr.msk.f32.vlgmr.msra.gmra.mxu1 %vm482_vm7, %v3378_v55  ;;  %1279 = vmatprep.subr.mxu1 %v3178_v17 }
 0x50a   :  { %1140 = vmatprep.mubr.f32.mxu1 %v3178_v17  ;;  %1280 = vmatpush1.msra.mxu1 %v3383_v57 }
 0x50b   :  { %1281 = vmatprep.subr.mxu1 %v3178_v17 }
 0x50c   :  { %1282 = vmatpush1.msra.mxu1 %v3391_v59 }
 0x50d   :  { %2733 = vmatmul.mubr.msk.f32.gmra.mxu1 %vm482_vm7, %v3402_v61  ;;  %1283 = vmatprep.subr.mxu1 %v3178_v17 }
 0x50e   :  { %1146 = vmatprep.mubr.f32.mxu1 %v3178_v17  ;;  %1284 = vmatpush1.msra.mxu1 %v3399_v60 }
 0x50f   :  { %1285 = vmatprep.subr.mxu1 %v3178_v17 }
 0x510   :  { %1286 = vmatpush1.msra.mxu1 %v3411_v62 }
 0x511   :  { %2734 = vmatmul.mubr.msk.f32.gmra.mxu1 %vm482_vm7, %v3414_v63  ;;  %1287 = vmatprep.subr.mxu1 %v3178_v17 }
 0x512   :  { %1152 = vmatprep.mubr.f32.mxu1 %v3178_v17  ;;  %1288 = vmatpush1.msra.mxu1 %v3422_v1 }
 0x513   :  { %1289 = vmatprep.subr.mxu1 %v3178_v17 }
 0x514   :  { %1290 = vmatpush1.msra.mxu1 %v3431_v2 }
 0x515   :  { %2735 = vmatmul.mubr.msk.f32.gmra.mxu1 %vm482_vm7, %v3442_v4  ;;  %1291 = vmatprep.subr.mxu1 %v3178_v17 }
 0x516   :  { %1292 = vmatpush1.msra.mxu1 %v3439_v3 }
 0x517   :  { %1293 = vmatprep.subr.mxu1 %v3178_v17 }
 0x518   :  { %1294 = vmatpush1.msra.mxu1 %v3451_v5 }
 0x519   :  { %1295 = vmatprep.subr.mxu1 %v3178_v17 }
 0x51a   :  { %1296 = vmatpush1.msra.mxu1 %v3458_v6 }
 0x51b   :  { %1297 = vmatprep.subr.mxu1 %v3178_v17 }
 0x51c   :  { %1298 = vmatpush1.msra.mxu1 %v3465_v7 }
 0x51d   :  { %1299 = vmatprep.subr.mxu1 %v3178_v17 }
 0x51e   :  { %1300 = vmatpush1.msra.mxu1 %v3472_v8 }
 0x51f   :  { %1301 = vmatprep.subr.mxu1 %v3178_v17 }
 0x520   :  { %1302 = vmatpush1.msra.mxu1 %v3479_v9 }
 0x521   :  { %1303 = vmatprep.subr.mxu1 %v3178_v17 }
 0x522   :  { %1304 = vmatpush1.msra.mxu1 %v3486_v10 }
 0x523   :  { %1305 = vmatprep.subr.mxu1 %v3178_v17 }
 0x524   :  { %1306 = vmatpush1.msra.mxu1 %v3493_v11 }
 0x525   :  { %1307 = vmatprep.subr.mxu1 %v3178_v17 }
 0x526   :  { %1308 = vmatpush1.msra.mxu1 %v3500_v12 }
 0x527   :  { %1309 = vmatprep.subr.mxu1 %v3178_v17 }
 0x528   :  { %1310 = vmatpush1.msra.mxu1 %v3507_v13 }
 0x529   :  { %1335 = vmatprep.subr.mxu1 %v3178_v17 }
 0x52a   :  { %1336 = vmatpush2.msra.mxu1 %v3514_v14 }
 0x52b   :  { %1337 = vmatprep.subr.mxu1 %v3178_v17 }
 0x52c   :  { %1338 = vmatpush2.msra.mxu1 %v3523_v15 }
 0x52d   :  { %1339 = vmatprep.subr.mxu1 %v3178_v17 }
 0x52e   :  { %1340 = vmatpush2.msra.mxu1 %v3530_v16 }
 0x52f   :  { %1341 = vmatprep.subr.mxu1 %v3178_v17 }
 0x530   :  { %1342 = vmatpush2.msra.mxu1 %v3537_v18 }
 0x531   :  { %2774 = vmatprep.subr.msk.mxu1 %vm601_vm3, %v2773_v34 }
 0x5c9   :  { %v1136_v28 = vpop.f32.mrf.mxu1 }
 0x5ca   :  { %v1259_v41 = vmul.f32 %v1236_v35, %v1136_v28 }
 0x5cb   :  { %v1138_v39 = vpop.f32.mrf.mxu1 }
 0x5cc   :  { %v1260_v40 = vmul.f32 %v1238_v27, %v1138_v39  ;;  %v2763_v39 = vld [vmem:[%s3934_s6 + $0xb8] sm:$0xff] }
 0x5cd   :  { %v1142_v43 = vpop.f32.mrf.mxu1 }
 0x5ce   :  { %2746 = vmatprep.mubr.msk.f32.mxu1 %vm146_vm4, %v1260_v40  ;;  %v1261_v48 = vmul.f32 %v1242_v36, %v1142_v43  ;;  %v2761_v40 = vld [vmem:[%s3934_s6 + $0xa8] sm:$0xff]  ;;  %v2758_v43 = vld [vmem:[%s3934_s6 + $0x90] sm:$0xff] }
 0x5cf   :  { %v1144_v53 = vpop.f32.mrf.mxu1  ;;  %1344 = vmatmul.mubr.f32.vlgmr.msra.gmra.mxu1 %v1259_v41  ;;  %v2760_v41 = vld [vmem:[%s3934_s6 + $0xa0] sm:$0xff] }
 0x5d0   :  { %v1262_v0 = vmul.f32 %v1244_v37, %v1144_v53  ;;  %2775 = vmatpush1.msk.msra.mxu1 %vm601_vm3, %v2772_v44  ;;  %v2757_v44 = vld [vmem:[%s3934_s6 + $0x88] sm:$0xff] }
 0x5d1   :  { %v1148_v20 = vpop.f32.mrf.mxu1  ;;  %1757 = vmatprep.subr.mxu1 %v2771_v49  ;;  %v2756_v49 = vld [vmem:[%s3934_s6 + $0x80] sm:$0xff] }
 0x5d2   :  { %2747 = vmatprep.mubr.msk.f32.mxu1 %vm146_vm4, %v1262_v0  ;;  %1758 = vmatpush1.msra.mxu1 %v2770_v56  ;;  %v1263_v24 = vmul.f32 %v1248_v38, %v1148_v20  ;;  %v1442_v38 = vld [vmem:[#allocation8 + $0x20] sm:$0xff] }
 0x5d3   :  { %v1150_v22 = vpop.f32.mrf.mxu1  ;;  %1349 = vmatmul.mubr.f32.gmra.mxu1 %v1261_v48 }
 0x5d4   :  { %v1264_v23 = vmul.f32 %v1250_v50, %v1150_v22 }
 0x5d5   :  { %v1154_v25 = vpop.f32.mrf.mxu1 }
 0x5d6   :  { %2748 = vmatprep.mubr.msk.f32.mxu1 %vm146_vm4, %v1264_v23  ;;  %v1265_v33 = vmul.f32 %v1254_v21, %v1154_v25  ;;  %v2755_v23 = vld [vmem:[%s3936_s8 + $0x2] ss:$0 sm:$0xff] }
 0x5d7   :  { %v1156_v31 = vpop.f32.mrf.mxu1  ;;  %1354 = vmatmul.mubr.f32.gmra.mxu1 %v1263_v24 }
 0x5d8   :  { %v1266_v32 = vmul.f32 %v1256_v30, %v1156_v31 }
 0x5da   :  { %2749 = vmatprep.mubr.msk.f32.mxu1 %vm146_vm4, %v1266_v32 }
 0x5db   :  { %1359 = vmatmul.mubr.f32.gmra.mxu1 %v1265_v33 }
 0x5dc   :  { %1791 = vmatprep.mubr.f32.mxu1 %v3178_v17 }
 0x5df   :  { %2776 = vmatmul.mubr.msk.f32.vlgmr.msra.gmra.mxu1 %vm588_vm5, %v3350_v42 }
 0x5e0   :  { %1797 = vmatprep.mubr.f32.mxu1 %v3178_v17 }
 0x5e3   :  { %2777 = vmatmul.mubr.msk.f32.gmra.mxu1 %vm588_vm5, %v3361_v45 }
 0x5e4   :  { %1803 = vmatprep.mubr.f32.mxu1 %v3178_v17 }
 0x5e7   :  { %2778 = vmatmul.mubr.msk.f32.gmra.mxu1 %vm588_vm5, %v3366_v46  ;;  %v1445_v46 = vld [vmem:[#allocation8 + $0x38] sm:$0xff] }
 0x5e8   :  { %1809 = vmatprep.mubr.f32.mxu1 %v3178_v17 }
 0x5eb   :  { %2779 = vmatmul.mubr.msk.f32.gmra.mxu1 %vm588_vm5, %v3371_v47  ;;  %v1444_v47 = vld [vmem:[#allocation8 + $0x30] sm:$0xff] }
 0x5ec   :  { %2953 = vmatprep.mubr.msk.f32.mxu1 %vm146_vm4, %v3575_v58  ;;  %v1443_v58 = vld [vmem:[#allocation8 + $0x28] sm:$0xff] }
 0x68f   :  { %v1345_v34 = vpop.f32.mrf.mxu1 }
 0x691   :  { %v1347_v42 = vpop.f32.mrf.mxu1 }
 0x693   :  { %v1350_v35 = vpop.f32.mrf.mxu1 }
 0x695   :  { %v1352_v27 = vpop.f32.mrf.mxu1 }
 0x697   :  { %v1355_v36 = vpop.f32.mrf.mxu1 }
 0x699   :  { %v1357_v37 = vpop.f32.mrf.mxu1 }
 0x69b   :  { %v1360_v45 = vpop.f32.mrf.mxu1 }
 0x69c   :  { %2923 = vmatprep.subr.mxu0 %v1360_v45 }
 0x69d   :  { %v1362_v28 = vpop.f32.mrf.mxu1  ;;  %2924 = vmatpush3.msra.mxu0 %v1360_v45 }
 0x69e   :  { %2925 = vmatprep.subr.mxu0 %v1355_v36 }
 0x69f   :  { %2926 = vmatpush3.msra.mxu0 %v1355_v36 }
 0x6a0   :  { %2927 = vmatprep.subr.mxu0 %v1350_v35 }
 0x6a1   :  { %2928 = vmatpush3.msra.mxu0 %v1350_v35 }
 0x6a2   :  { %2929 = vmatprep.subr.mxu0 %v1345_v34 }
 0x6a3   :  { %2930 = vmatpush3.msra.mxu0 %v1345_v34 }
 0x6a4   :  { %2932 = vmatmul.mubr.msk.f32.vlgmr.msra.gmra.mxu0 %vm146_vm4, %v3583_v19  ;;  %2934 = vmatprep.subr.mxu0 %v1445_v46 }
 0x6a5   :  { %2935 = vmatpush3.msra.mxu0 %v1445_v46  ;;  %2942 = vmatprep.mubr.msk.f32.mxu0 %vm146_vm4, %v3629_v26  ;;  %v2762_v26 = vld [vmem:[%s3934_s6 + $0xb0] sm:$0xff] }
 0x6a6   :  { %2936 = vmatprep.subr.mxu0 %v1444_v47 }
 0x6a7   :  { %2937 = vmatpush3.msra.mxu0 %v1444_v47 }
 0x6a8   :  { %2938 = vmatprep.subr.mxu0 %v1443_v58 }
 0x6a9   :  { %2939 = vmatpush3.msra.mxu0 %v1443_v58  ;;  %v2002_v58 = vld [vmem:[#allocation8 + $0x58] sm:$0xff] }
 0x6aa   :  { %2940 = vmatprep.subr.mxu0 %v1442_v38 }
 0x6ab   :  { %2941 = vmatpush3.msra.mxu0 %v1442_v38  ;;  %v2001_v38 = vld [vmem:[#allocation8 + $0x50] sm:$0xff] }
 0x6ac   :  { %2943 = vmatmul.mubr.msk.f32.vlgmr.msra.gmra.mxu0 %vm146_vm4, %v3634_v29  ;;  %1574 = vmatprep.subr.mxu0 %v2763_v39  ;;  %v2759_v29 = vld [vmem:[%s3934_s6 + $0x98] sm:$0xff] }
 0x6ad   :  { %1614 = vmatprep.mubr.f32.mxu0 %v3178_v17  ;;  %1575 = vmatpush1.msra.mxu0 %v2762_v26  ;;  %v2000_v39 = vld [vmem:[#allocation8 + $0x48] sm:$0xff]  ;;  %v1999_v26 = vld [vmem:[#allocation8 + $0x40] sm:$0xff] }
 0x6ae   :  { %1576 = vmatprep.subr.mxu0 %v2761_v40 }
 0x6af   :  { %1577 = vmatpush1.msra.mxu0 %v2760_v41 }
 0x6b0   :  { %1578 = vmatprep.subr.mxu0 %v2759_v29  ;;  %v2690_v29 = vld [vmem:[#allocation5] ss:$0 sm:$0xff] }
 0x6b1   :  { %1579 = vmatpush1.msra.mxu0 %v2758_v43  ;;  %vm143_vm14 = vcmp.eq.s32.totalorder %v3571_v54, %v2690_v29  ;;  %v2207_v54 = vld [vmem:[#allocation8 + $0x70] sm:$0xff] }
 0x6b2   :  { %1580 = vmatprep.subr.mxu0 %v2757_v44  ;;  %v2789_v44 = vld [vmem:[%s3936_s8 + $0x3] ss:$0 sm:$0xff] }
 0x6b3   :  { %1581 = vmatpush1.msra.mxu0 %v2756_v49 }
 0x764   :  { %v2933_v50 = vpop.f32.mrf.mxu0 }
 0x765   :  { %v1440_v0 = vmul.f32 %v3620_v51, %v2933_v50 }
 0x766   :  { %v1430_v53 = vpop.f32.mrf.mxu0 }
 0x767   :  { %v1439_v48 = vmul.f32 %v3622_v52, %v1430_v53 }
 0x76c   :  { %v2944_v56 = vpop.f32.mrf.mxu0 }
 0x76d   :  { %v1522_v21 = vadd.f32 %v2944_v56, %v1440_v0 }
 0x76e   :  { %v1512_v20 = vpop.f32.mrf.mxu0 }
 0x76f   :  { %v1521_v22 = vadd.f32 %v1512_v20, %v1439_v48  ;;  %v1532_v25 = vadd.f32 %v2755_v23, %v1522_v21  ;;  %v2691_v20 = vsel %vm143_vm14, 1.0, %v3178_v17  ;;  %v2205_v21 = vld [vmem:[#allocation8 + $0x60] sm:$0xff] }
 0x771   :  { %v1531_v24 = vadd.f32 %v2755_v23, %v1521_v22 }
 0x773   :  { %3046 = vtanh.f32 %v1531_v24 }
 0x774   :  { %3048 = vtanh.f32 %v1532_v25 }
 0x780   :  { %v3758_v30 = vpop.eup %3046 }
 0x781   :  { %2764 = vmatmul.mubr.msk.f32.vlgmr.msra.gmra.mxu0 %vm146_vm4, %v3758_v30  ;;  %v3763_v31 = vpop.eup %3048 }
 0x782   :  { %1620 = vmatprep.mubr.f32.mxu0 %v3178_v17 }
 0x785   :  { %2765 = vmatmul.mubr.msk.f32.gmra.mxu0 %vm146_vm4, %v3763_v31 }
 0x786   :  { %1691 = vmatprep.mubr.f32.mxu0 %v3178_v17 }
 0x841   :  { %v1616_v32 = vpop.f32.mrf.mxu0 }
 0x843   :  { %v1618_v33 = vpop.f32.mrf.mxu0 }
 0x845   :  { %v1622_v34 = vpop.f32.mrf.mxu0 }
 0x847   :  { %v1624_v42 = vpop.f32.mrf.mxu0 }
 0x848   :  { %1655 = vmatprep.subr.mxu0 %v1624_v42 }
 0x849   :  { %1656 = vmatpush1.msra.mxu0 %v1622_v34 }
 0x84a   :  { %1657 = vmatprep.subr.mxu0 %v1618_v33 }
 0x84b   :  { %1658 = vmatpush1.msra.mxu0 %v1616_v32 }
 0x84c   :  { %2766 = vmatmul.mubr.msk.f32.vlgmr.msra.gmra.mxu0 %vm482_vm7, %v3378_v55  ;;  %1836 = vmatprep.subr.mxu0 %v3178_v17  ;;  %v1793_v55 = vpop.f32.mrf.mxu1 }
 0x84d   :  { %1697 = vmatprep.mubr.f32.mxu0 %v3178_v17  ;;  %1837 = vmatpush1.msra.mxu0 %v3383_v57 }
 0x84e   :  { %1838 = vmatprep.subr.mxu0 %v3178_v17  ;;  %v1795_v57 = vpop.f32.mrf.mxu1 }
 0x84f   :  { %1839 = vmatpush1.msra.mxu0 %v3391_v59 }
 0x850   :  { %2767 = vmatmul.mubr.msk.f32.gmra.mxu0 %vm482_vm7, %v3402_v61  ;;  %1840 = vmatprep.subr.mxu0 %v3178_v17  ;;  %v1799_v59 = vpop.f32.mrf.mxu1 }
 0x851   :  { %1703 = vmatprep.mubr.f32.mxu0 %v3178_v17  ;;  %1841 = vmatpush1.msra.mxu0 %v3399_v60 }
 0x852   :  { %1842 = vmatprep.subr.mxu0 %v3178_v17  ;;  %v1801_v60 = vpop.f32.mrf.mxu1 }
 0x853   :  { %1843 = vmatpush1.msra.mxu0 %v3411_v62 }
 0x854   :  { %2768 = vmatmul.mubr.msk.f32.gmra.mxu0 %vm482_vm7, %v3414_v63  ;;  %1844 = vmatprep.subr.mxu0 %v3178_v17  ;;  %v1805_v62 = vpop.f32.mrf.mxu1 }
 0x855   :  { %1709 = vmatprep.mubr.f32.mxu0 %v3178_v17  ;;  %1845 = vmatpush1.msra.mxu0 %v3422_v1 }
 0x856   :  { %1846 = vmatprep.subr.mxu0 %v3178_v17 }
 0x857   :  { %1847 = vmatpush1.msra.mxu0 %v3431_v2 }
 0x858   :  { %2769 = vmatmul.mubr.msk.f32.gmra.mxu0 %vm482_vm7, %v3442_v4  ;;  %1848 = vmatprep.subr.mxu0 %v3178_v17  ;;  %v1807_v4 = vpop.f32.mrf.mxu1 }
 0x859   :  { %1849 = vmatpush1.msra.mxu0 %v3439_v3 }
 0x85a   :  { %1850 = vmatprep.subr.mxu0 %v3178_v17 }
 0x85b   :  { %1851 = vmatpush1.msra.mxu0 %v3451_v5 }
 0x85c   :  { %1852 = vmatprep.subr.mxu0 %v3178_v17 }
 0x85d   :  { %1853 = vmatpush1.msra.mxu0 %v3458_v6 }
 0x85e   :  { %1854 = vmatprep.subr.mxu0 %v3178_v17 }
 0x85f   :  { %1855 = vmatpush1.msra.mxu0 %v3465_v7 }
 0x860   :  { %1856 = vmatprep.subr.mxu0 %v3178_v17 }
 0x861   :  { %1857 = vmatpush1.msra.mxu0 %v3472_v8 }
 0x862   :  { %1858 = vmatprep.subr.mxu0 %v3178_v17 }
 0x863   :  { %1859 = vmatpush1.msra.mxu0 %v3479_v9  ;;  %v1811_v9 = vpop.f32.mrf.mxu1 }
 0x864   :  { %1860 = vmatprep.subr.mxu0 %v3178_v17 }
 0x865   :  { %1861 = vmatpush1.msra.mxu0 %v3486_v10 }
 0x866   :  { %1862 = vmatprep.subr.mxu0 %v3178_v17 }
 0x867   :  { %1863 = vmatpush1.msra.mxu0 %v3493_v11 }
 0x868   :  { %1864 = vmatprep.subr.mxu0 %v3178_v17 }
 0x869   :  { %1865 = vmatpush1.msra.mxu0 %v3500_v12 }
 0x86a   :  { %1866 = vmatprep.subr.mxu0 %v3178_v17 }
 0x86b   :  { %1867 = vmatpush1.msra.mxu0 %v3507_v13 }
 0x86c   :  { %1892 = vmatprep.subr.mxu0 %v3178_v17 }
 0x86d   :  { %1893 = vmatpush2.msra.mxu0 %v3514_v14  ;;  %v1813_v14 = vpop.f32.mrf.mxu1 }
 0x86e   :  { %1894 = vmatprep.subr.mxu0 %v3178_v17 }
 0x86f   :  { %1895 = vmatpush2.msra.mxu0 %v3523_v15 }
 0x870   :  { %1896 = vmatprep.subr.mxu0 %v3178_v17 }
 0x871   :  { %1897 = vmatpush2.msra.mxu0 %v3530_v16 }
 0x872   :  { %1898 = vmatprep.subr.mxu0 %v3178_v17 }
 0x873   :  { %1899 = vmatpush2.msra.mxu0 %v3537_v18 }
 0x874   :  { %2996 = vmatprep.subr.mxu0 %v3178_v17 }
 0x90c   :  { %v1693_v61 = vpop.f32.mrf.mxu0 }
 0x90d   :  { %v1816_v2 = vmul.f32 %v1793_v55, %v1693_v61 }
 0x90e   :  { %v1695_v63 = vpop.f32.mrf.mxu0 }
 0x90f   :  { %v1817_v1 = vmul.f32 %v1795_v57, %v1695_v63 }
 0x910   :  { %v1699_v3 = vpop.f32.mrf.mxu0 }
 0x911   :  { %2780 = vmatprep.mubr.msk.f32.mxu0 %vm146_vm4, %v1817_v1  ;;  %v1818_v7 = vmul.f32 %v1799_v59, %v1699_v3 }
 0x912   :  { %v1701_v5 = vpop.f32.mrf.mxu0  ;;  %1901 = vmatmul.mubr.f32.vlgmr.msra.gmra.mxu0 %v1816_v2 }
 0x913   :  { %v1819_v6 = vmul.f32 %v1801_v60, %v1701_v5 }
 0x914   :  { %v1705_v8 = vpop.f32.mrf.mxu0 }
 0x915   :  { %2781 = vmatprep.mubr.msk.f32.mxu0 %vm146_vm4, %v1819_v6  ;;  %v1820_v12 = vmul.f32 %v1805_v62, %v1705_v8  ;;  %v2792_v6 = vld [vmem:[%s3936_s8 + $0x4] ss:$0 sm:$0xff]  ;;  %v2794_v8 = vld [vmem:[%s3936_s8 + $0x8] ss:$0 sm:$0xff] }
 0x916   :  { %v1707_v10 = vpop.f32.mrf.mxu0  ;;  %1906 = vmatmul.mubr.f32.gmra.mxu0 %v1818_v7 }
 0x917   :  { %v1821_v11 = vmul.f32 %v1807_v4, %v1707_v10 }
 0x918   :  { %v1711_v13 = vpop.f32.mrf.mxu0 }
 0x919   :  { %2782 = vmatprep.mubr.msk.f32.mxu0 %vm146_vm4, %v1821_v11  ;;  %v1822_v18 = vmul.f32 %v1811_v9, %v1711_v13  ;;  %v2334_v11 = vld [vmem:[#allocation8 + $0x98] sm:$0xff]  ;;  %v2332_v13 = vld [vmem:[#allocation8 + $0x88] sm:$0xff] }
 0x91a   :  { %v1713_v15 = vpop.f32.mrf.mxu0  ;;  %1911 = vmatmul.mubr.f32.gmra.mxu0 %v1820_v12  ;;  %v2333_v12 = vld [vmem:[#allocation8 + $0x90] sm:$0xff] }
 0x91b   :  { %v1823_v16 = vmul.f32 %v1813_v14, %v1713_v15  ;;  %v2331_v14 = vld [vmem:[#allocation8 + $0x80] sm:$0xff] }
 0x91c   :  { %v2796_v15 = vld [vmem:[%s3936_s8 + $0xc] ss:$0 sm:$0xff] }
 0x91d   :  { %2783 = vmatprep.mubr.msk.f32.mxu0 %vm146_vm4, %v1823_v16 }
 0x91e   :  { %1916 = vmatmul.mubr.f32.gmra.mxu0 %v1822_v18 }
 0x91f   :  { %3004 = vmatprep.mubr.msk.f32.mxu0 %vm3180_vm13, %v3178_v17 }
 0x9d2   :  { %v1902_v35 = vpop.f32.mrf.mxu0 }
 0x9d4   :  { %v1904_v27 = vpop.f32.mrf.mxu0 }
 0x9d6   :  { %v1907_v36 = vpop.f32.mrf.mxu0 }
 0x9d8   :  { %v1909_v37 = vpop.f32.mrf.mxu0 }
 0x9da   :  { %v1912_v45 = vpop.f32.mrf.mxu0 }
 0x9dc   :  { %v1914_v28 = vpop.f32.mrf.mxu0 }
 0x9de   :  { %v1917_v46 = vpop.f32.mrf.mxu0 }
 0x9df   :  { %2945 = vmatprep.subr.mxu1 %v1917_v46 }
 0x9e0   :  { %v1919_v47 = vpop.f32.mrf.mxu0  ;;  %2946 = vmatpush3.msra.mxu1 %v1917_v46 }
 0x9e1   :  { %2947 = vmatprep.subr.mxu1 %v1912_v45 }
 0x9e2   :  { %2948 = vmatpush3.msra.mxu1 %v1912_v45 }
 0x9e3   :  { %2949 = vmatprep.subr.mxu1 %v1907_v36 }
 0x9e4   :  { %2950 = vmatpush3.msra.mxu1 %v1907_v36 }
 0x9e5   :  { %2951 = vmatprep.subr.mxu1 %v1902_v35 }
 0x9e6   :  { %2952 = vmatpush3.msra.mxu1 %v1902_v35 }
 0x9e7   :  { %2954 = vmatmul.mubr.msk.f32.vlgmr.msra.gmra.mxu1 %vm146_vm4, %v3583_v19  ;;  %2956 = vmatprep.subr.mxu1 %v2002_v58 }
 0x9e8   :  { %2957 = vmatpush3.msra.mxu1 %v2002_v58  ;;  %2964 = vmatprep.mubr.msk.f32.mxu1 %vm146_vm4, %v3758_v30 }
 0x9e9   :  { %2958 = vmatprep.subr.mxu1 %v2001_v38 }
 0x9ea   :  { %2959 = vmatpush3.msra.mxu1 %v2001_v38 }
 0x9eb   :  { %2960 = vmatprep.subr.mxu1 %v2000_v39 }
 0x9ec   :  { %2961 = vmatpush3.msra.mxu1 %v2000_v39 }
 0x9ed   :  { %2962 = vmatprep.subr.mxu1 %v1999_v26 }
 0x9ee   :  { %2963 = vmatpush3.msra.mxu1 %v1999_v26 }
 0x9ef   :  { %2965 = vmatmul.mubr.msk.f32.vlgmr.msra.gmra.mxu1 %vm146_vm4, %v3763_v31  ;;  %2967 = vmatprep.subr.mxu1 %v3178_v17 }
 0x9f0   :  { %2971 = vmatprep.mubr.msk.f32.mxu1 %vm3180_vm13, %v3178_v17 }
 0xaa7   :  { %v2955_v19 = vpop.f32.mrf.mxu1 }
 0xaa8   :  { %v1997_v41 = vmul.f32 %v3620_v51, %v2955_v19  ;;  %v2208_v51 = vld [vmem:[#allocation8 + $0x78] sm:$0xff] }
 0xaa9   :  { %v1987_v40 = vpop.f32.mrf.mxu1 }
 0xaaa   :  { %v1996_v49 = vmul.f32 %v3622_v52, %v1987_v40  ;;  %v2206_v52 = vld [vmem:[#allocation8 + $0x68] sm:$0xff] }
 0xaaf   :  { %v2966_v43 = vpop.f32.mrf.mxu1 }
 0xab0   :  { %v2079_v50 = vadd.f32 %v2966_v43, %v1997_v41 }
 0xab1   :  { %v2069_v53 = vpop.f32.mrf.mxu1 }
 0xab2   :  { %v2089_v56 = vadd.f32 %v2789_v44, %v2079_v50  ;;  %v2078_v0 = vadd.f32 %v2069_v53, %v1996_v49 }
 0xab4   :  { %v2088_v48 = vadd.f32 %v2789_v44, %v2078_v0  ;;  %2968 = vmatpush3.msra.mxu1 %v2089_v56  ;;  %v2799_v0 = vld [vmem:[%s3936_s8 + $0x5] ss:$0 sm:$0xff] }
 0xab5   :  { %2969 = vmatprep.subr.mxu1 %v3178_v17 }
 0xab6   :  { %2970 = vmatpush3.msra.mxu1 %v2088_v48 }
 0xab7   :  { %2972 = vmatmul.mubr.msk.f32.vlgmr.msra.gmra.mxu1 %vm482_vm7, %v2691_v20  ;;  %2974 = vmatprep.subr.mxu1 %v3178_v17  ;;  %v2801_v20 = vld [vmem:[%s3936_s8 + $0x9] ss:$0 sm:$0xff] }
 0xab8   :  { %2982 = vmatprep.mubr.msk.f32.mxu1 %vm3180_vm13, %v3178_v17  ;;  %2975 = vmatpush3.msra.mxu1 %v2208_v51 }
 0xab9   :  { %2976 = vmatprep.subr.mxu1 %v3178_v17 }
 0xaba   :  { %2977 = vmatpush3.msra.mxu1 %v2207_v54 }
 0xabb   :  { %2978 = vmatprep.subr.mxu1 %v3178_v17 }
 0xabc   :  { %2979 = vmatpush3.msra.mxu1 %v2206_v52  ;;  %v2460_v52 = vld [vmem:[#allocation8 + $0xb8] sm:$0xff] }
 0xabd   :  { %2980 = vmatprep.subr.mxu1 %v3178_v17  ;;  %2997 = vmatpush3.msra.mxu0 %v2460_v52 }
 0xabe   :  { %2981 = vmatpush3.msra.mxu1 %v2205_v21  ;;  %2998 = vmatprep.subr.mxu0 %v3178_v17  ;;  %v2459_v21 = vld [vmem:[#allocation8 + $0xb0] sm:$0xff] }
 0xabf   :  { %2985 = vmatprep.subr.mxu1 %v3178_v17  ;;  %2999 = vmatpush3.msra.mxu0 %v2459_v21  ;;  %v2815_v21 = vld [vmem:[%s3936_s8 + $0xb] ss:$0 sm:$0xff] }
 0xac0   :  { %3000 = vmatprep.subr.mxu0 %v3178_v17 }
 0xb77   :  { %v2159_v22 = vpop.f32.mrf.mxu1 }
 0xb78   :  { %v2164_v23 = vsel %vm2163_vm15, %v2159_v22, 0.0 }
 0xb79   :  { %v2165_v24 = vrot.slane %v2164_v23, 4  ;;  %v2973_v25 = vpop.f32.mrf.mxu1 }
 0xb7b   :  { %v2166_v30 = vadd.f32 %v2165_v24, %v2164_v23  ;;  %v2457_v23 = vld [vmem:[#allocation8 + $0xa0] sm:$0xff] }
 0xb7c   :  { %v2803_v24 = vld [vmem:[%s3936_s8 + $0xd] ss:$0 sm:$0xff] }
 0xb7d   :  { %v2167_v31 = vrot.slane %v2166_v30, 2 }
 0xb7f   :  { %v2168_v32 = vadd.f32 %v2167_v31, %v2166_v30 }
 0xb81   :  { %v2169_v33 = vrot.slane %v2168_v32, 1 }
 0xb83   :  { %v2170_v34 = vadd.f32 %v2169_v33, %v2168_v32 }
 0xb85   :  { %v2172_v42 = vmul.f32 0.5, %v2170_v34 }
 0xb87   :  { %v2173_v55 = vsub.f32 %v2159_v22, %v2172_v42  ;;  %v2458_v22 = vld [vmem:[#allocation8 + $0xa8] sm:$0xff] }
 0xb88   :  { %3001 = vmatpush3.msra.mxu0 %v2458_v22 }
 0xb89   :  { %v2174_v57 = vmul.f32 %v2173_v55, %v2173_v55  ;;  %3002 = vmatprep.subr.mxu0 %v3178_v17 }
 0xb8a   :  { %3003 = vmatpush3.msra.mxu0 %v2457_v23 }
 0xb8b   :  { %v2175_v59 = vsel %vm2163_vm15, %v2174_v57, 0.0 }
 0xb8c   :  { %v2176_v60 = vrot.slane %v2175_v59, 4 }
 0xb8e   :  { %v2177_v61 = vadd.f32 %v2176_v60, %v2175_v59 }
 0xb90   :  { %v2178_v62 = vrot.slane %v2177_v61, 2 }
 0xb92   :  { %v2179_v63 = vadd.f32 %v2178_v62, %v2177_v61 }
 0xb94   :  { %v2180_v1 = vrot.slane %v2179_v63, 1 }
 0xb96   :  { %v2181_v2 = vadd.f32 %v2180_v1, %v2179_v63 }
 0xb98   :  { %v2182_v3 = vmul.f32 0.5, %v2181_v2 }
 0xb9a   :  { %v2183_v4 = vadd.f32 1e-05, %v2182_v3 }
 0xb9c   :  { %3050 = vrsqrt.f32 %v2183_v4 }
 0xba9   :  { %v3051_v5 = vpop.eup %3050 }
 0xbaa   :  { %v2185_v7 = vmul.f32 %v3051_v5, %v2173_v55 }
 0xbac   :  { %v2194_v9 = vmul.f32 %v2792_v6, %v2185_v7 }
 0xbae   :  { %v2203_v10 = vadd.f32 %v2794_v8, %v2194_v9 }
 0xbb0   :  { %2983 = vmatmul.mubr.msk.f32.vlgmr.msra.gmra.mxu1 %vm146_vm4, %v2203_v10 }
 0xbb1   :  { %2993 = vmatprep.mubr.msk.f32.mxu1 %vm3180_vm13, %v3178_v17  ;;  %2986 = vmatpush3.msra.mxu1 %v2334_v11  ;;  %v2806_v11 = vld [vmem:[%s3936_s8 + $0x6] ss:$0 sm:$0xff] }
 0xbb2   :  { %2987 = vmatprep.subr.mxu1 %v3178_v17 }
 0xbb3   :  { %2988 = vmatpush3.msra.mxu1 %v2333_v12 }
 0xbb4   :  { %2989 = vmatprep.subr.mxu1 %v3178_v17 }
 0xbb5   :  { %2990 = vmatpush3.msra.mxu1 %v2332_v13  ;;  %v2808_v13 = vld [vmem:[%s3936_s8 + $0xa] ss:$0 sm:$0xff] }
 0xbb6   :  { %2991 = vmatprep.subr.mxu1 %v3178_v17 }
 0xbb7   :  { %2992 = vmatpush3.msra.mxu1 %v2331_v14 }
 0xbb8   :  { %3007 = vmatprep.subr.mxu1 %v3178_v17 }
 0xc70   :  { %v2286_v16 = vpop.f32.mrf.mxu1 }
 0xc71   :  { %v2287_v18 = vadd.f32 %v2796_v15, %v2286_v16  ;;  %v2585_v16 = vld [vmem:[%s3940_s12 + $0x18] sm:$0xff] }
 0xc72   :  { %v2984_v35 = vpop.f32.mrf.mxu1 }
 0xc73   :  { %3052 = vtanh.f32 %v2287_v18  ;;  %v2584_v18 = vld [vmem:[%s3940_s12 + $0x10] sm:$0xff]  ;;  %v2583_v35 = vld [vmem:[%s3940_s12 + $0x8] sm:$0xff] }
 0xc80   :  { %v3053_v27 = vpop.eup %3052 }
 0xc81   :  { %v2291_v36 = vsel %vm2163_vm15, %v3053_v27, 0.0 }
 0xc82   :  { %v2292_v37 = vrot.slane %v2291_v36, 4 }
 0xc84   :  { %v2293_v45 = vadd.f32 %v2292_v37, %v2291_v36  ;;  %v2810_v36 = vld [vmem:[%s3936_s8 + $0xe] ss:$0 sm:$0xff] }
 0xc86   :  { %v2294_v28 = vrot.slane %v2293_v45, 2 }
 0xc88   :  { %v2295_v46 = vadd.f32 %v2294_v28, %v2293_v45 }
 0xc8a   :  { %v2296_v47 = vrot.slane %v2295_v46, 1 }
 0xc8c   :  { %v2297_v58 = vadd.f32 %v2296_v47, %v2295_v46 }
 0xc8e   :  { %v2298_v38 = vmul.f32 0.5, %v2297_v58 }
 0xc90   :  { %v2299_v39 = vsub.f32 %v3053_v27, %v2298_v38  ;;  %v2582_v27 = vld [vmem:[%s3940_s12] sm:$0xff] }
 0xc92   :  { %v2300_v26 = vmul.f32 %v2299_v39, %v2299_v39 }
 0xc94   :  { %v2301_v19 = vsel %vm2163_vm15, %v2300_v26, 0.0 }
 0xc95   :  { %v2302_v40 = vrot.slane %v2301_v19, 4 }
 0xc97   :  { %v2303_v41 = vadd.f32 %v2302_v40, %v2301_v19 }
 0xc99   :  { %v2304_v29 = vrot.slane %v2303_v41, 2 }
 0xc9b   :  { %v2305_v43 = vadd.f32 %v2304_v29, %v2303_v41 }
 0xc9d   :  { %v2306_v44 = vrot.slane %v2305_v43, 1 }
 0xc9f   :  { %v2307_v49 = vadd.f32 %v2306_v44, %v2305_v43 }
 0xca1   :  { %v2308_v50 = vmul.f32 0.5, %v2307_v49 }
 0xca3   :  { %v2309_v53 = vadd.f32 1e-05, %v2308_v50 }
 0xca5   :  { %3054 = vrsqrt.f32 %v2309_v53 }
 0xcb2   :  { %v3055_v56 = vpop.eup %3054 }
 0xcb3   :  { %v2311_v48 = vmul.f32 %v3055_v56, %v2299_v39 }
 0xcb5   :  { %v2320_v51 = vmul.f32 %v2799_v0, %v2311_v48 }
 0xcb7   :  { %v2329_v54 = vadd.f32 %v2801_v20, %v2320_v51 }
 0xcb9   :  { %2994 = vmatmul.mubr.msk.f32.vlgmr.msra.gmra.mxu1 %vm146_vm4, %v2329_v54  ;;  %v2813_v54 = vld [vmem:[%s3936_s8 + $0x7] ss:$0 sm:$0xff] }
 0xcba   :  { %3015 = vmatprep.mubr.msk.f32.mxu1 %vm3180_vm13, %v3178_v17  ;;  %3008 = vmatpush3.msra.mxu1 %v2585_v16 }
 0xcbb   :  { %3009 = vmatprep.subr.mxu1 %v3178_v17 }
 0xcbc   :  { %3010 = vmatpush3.msra.mxu1 %v2584_v18 }
 0xcbd   :  { %3011 = vmatprep.subr.mxu1 %v3178_v17 }
 0xcbe   :  { %3012 = vmatpush3.msra.mxu1 %v2583_v35 }
 0xcbf   :  { %3013 = vmatprep.subr.mxu1 %v3178_v17 }
 0xcc0   :  { %3014 = vmatpush3.msra.mxu1 %v2582_v27 }
 0xd79   :  { %v2412_v25 = vpop.f32.mrf.mxu1 }
 0xd7a   :  { %v2413_v30 = vadd.f32 %v2803_v24, %v2412_v25  ;;  %v2816_v24 = vld [vmem:[%s3940_s12 + $0x20] ss:$0 sm:$0xff] }
 0xd7b   :  { %v2995_v31 = vpop.f32.mrf.mxu1 }
 0xd7c   :  { %3056 = vtanh.f32 %v2413_v30 }
 0xd89   :  { %v3057_v32 = vpop.eup %3056 }
 0xd8a   :  { %v2417_v33 = vsel %vm2163_vm15, %v3057_v32, 0.0 }
 0xd8b   :  { %v2418_v34 = vrot.slane %v2417_v33, 4 }
 0xd8d   :  { %v2419_v42 = vadd.f32 %v2418_v34, %v2417_v33 }
 0xd8f   :  { %v2420_v55 = vrot.slane %v2419_v42, 2 }
 0xd91   :  { %v2421_v57 = vadd.f32 %v2420_v55, %v2419_v42 }
 0xd93   :  { %v2422_v59 = vrot.slane %v2421_v57, 1 }
 0xd95   :  { %v2423_v60 = vadd.f32 %v2422_v59, %v2421_v57 }
 0xd97   :  { %v2424_v61 = vmul.f32 0.5, %v2423_v60 }
 0xd99   :  { %v2425_v62 = vsub.f32 %v3057_v32, %v2424_v61 }
 0xd9b   :  { %v2426_v63 = vmul.f32 %v2425_v62, %v2425_v62 }
 0xd9d   :  { %v2427_v1 = vsel %vm2163_vm15, %v2426_v63, 0.0 }
 0xd9e   :  { %v2428_v2 = vrot.slane %v2427_v1, 4 }
 0xda0   :  { %v2429_v3 = vadd.f32 %v2428_v2, %v2427_v1 }
 0xda2   :  { %v2430_v4 = vrot.slane %v2429_v3, 2 }
 0xda4   :  { %v2431_v5 = vadd.f32 %v2430_v4, %v2429_v3 }
 0xda6   :  { %v2432_v6 = vrot.slane %v2431_v5, 1 }
 0xda8   :  { %v2433_v7 = vadd.f32 %v2432_v6, %v2431_v5 }
 0xdaa   :  { %v2434_v8 = vmul.f32 0.5, %v2433_v7 }
 0xdac   :  { %v2435_v9 = vadd.f32 1e-05, %v2434_v8 }
 0xdae   :  { %3058 = vrsqrt.f32 %v2435_v9 }
 0xdbb   :  { %v3059_v10 = vpop.eup %3058 }
 0xdbc   :  { %v2437_v12 = vmul.f32 %v3059_v10, %v2425_v62 }
 0xdbe   :  { %v2446_v14 = vmul.f32 %v2806_v11, %v2437_v12 }
 0xdc0   :  { %v2455_v15 = vadd.f32 %v2808_v13, %v2446_v14 }
 0xdc2   :  { %3005 = vmatmul.mubr.msk.f32.vlgmr.msra.gmra.mxu0 %vm146_vm4, %v2455_v15 }
 0xe82   :  { %v2538_v37 = vpop.f32.mrf.mxu0 }
 0xe83   :  { %v2539_v45 = vadd.f32 %v2810_v36, %v2538_v37 }
 0xe84   :  { %v3006_v28 = vpop.f32.mrf.mxu0 }
 0xe85   :  { %3060 = vtanh.f32 %v2539_v45 }
 0xe92   :  { %v3061_v46 = vpop.eup %3060 }
 0xe93   :  { %v2543_v47 = vsel %vm2163_vm15, %v3061_v46, 0.0 }
 0xe94   :  { %v2544_v58 = vrot.slane %v2543_v47, 4 }
 0xe96   :  { %v2545_v38 = vadd.f32 %v2544_v58, %v2543_v47 }
 0xe98   :  { %v2546_v39 = vrot.slane %v2545_v38, 2 }
 0xe9a   :  { %v2547_v26 = vadd.f32 %v2546_v39, %v2545_v38 }
 0xe9c   :  { %v2548_v19 = vrot.slane %v2547_v26, 1 }
 0xe9e   :  { %v2549_v40 = vadd.f32 %v2548_v19, %v2547_v26 }
 0xea0   :  { %v2550_v41 = vmul.f32 0.5, %v2549_v40 }
 0xea2   :  { %v2551_v17 = vsub.f32 %v3061_v46, %v2550_v41 }
 0xea4   :  { %v2552_v29 = vmul.f32 %v2551_v17, %v2551_v17 }
 0xea6   :  { %v2553_v43 = vsel %vm2163_vm15, %v2552_v29, 0.0 }
 0xea7   :  { %v2554_v44 = vrot.slane %v2553_v43, 4 }
 0xea9   :  { %v2555_v49 = vadd.f32 %v2554_v44, %v2553_v43 }
 0xeab   :  { %v2556_v50 = vrot.slane %v2555_v49, 2 }
 0xead   :  { %v2557_v53 = vadd.f32 %v2556_v50, %v2555_v49 }
 0xeaf   :  { %v2558_v56 = vrot.slane %v2557_v53, 1 }
 0xeb1   :  { %v2559_v0 = vadd.f32 %v2558_v56, %v2557_v53 }
 0xeb3   :  { %v2560_v48 = vmul.f32 0.5, %v2559_v0 }
 0xeb5   :  { %v2561_v20 = vadd.f32 1e-05, %v2560_v48 }
 0xeb7   :  { %3062 = vrsqrt.f32 %v2561_v20 }
 0xec4   :  { %v3063_v51 = vpop.eup %3062 }
 0xec5   :  { %v2563_v52 = vmul.f32 %v3063_v51, %v2551_v17 }
 0xec7   :  { %v2572_v22 = vmul.f32 %v2813_v54, %v2563_v52 }
 0xec9   :  { %v2581_v23 = vadd.f32 %v2815_v21, %v2572_v22 }
 0xecb   :  { %3016 = vmatmul.mubr.msk.f32.vlgmr.msra.gmra.mxu1 %vm146_vm4, %v2581_v23 }
 0xf8b   :  { %v2660_v25 = vpop.f32.mrf.mxu1 }
 0xf8c   :  { %v2661_v30 = vadd.f32 %v2816_v24, %v2660_v25 }
 0xf8d   :  { %v3017_v31 = vpop.f32.mrf.mxu1 }
 0xf8e   :  { %2665 = vst.msk [vmem:[#allocation10] sm:$0x3] %vm2664_vm0, %v2661_v30 }
 0xf8f   :  { %3155 = shalt.err (!%p3152_p10)
}
 0xf90   :  { %2675 = dma.vmem_to_hbm [thread:$0]  %s2673_s2, 32, %s3941_s13, [#allocation4]  }
 0xf91   :  { %3170 = dma.done.wait [#allocation4], 32  }
 0xf92   :  { %3171 = vsyncadd [#allocation4], 4294967264 }
 0xf93   :  { %2679 = vsyncpa [#allocation3], 1 }
 0xf94   :  { %2680 = vsyncpa [#allocation6], 1 }
 0xf95   :  { %2681 = vsyncpa [#allocation9], 1 }
 0xf96   :  { %2682 = vsyncpa [#allocation4], 1 }

</bundles_post_ra>
